<compile_context>
chip_gen: v7x
topology: tpu7x:2x2x1
jax: 0.10.0
libtpu: 0.0.40
codegen_flags: <defaults>
</compile_context>

<pallas_src>
import functools

import jax
import jax.numpy as jnp
from jax.experimental import pallas as pl
from jax.experimental.pallas import tpu as pltpu

LANE = 128          # TPU lane width; channel dims are padded to a multiple
BN_EPS = 1e-5       # matches torch.nn.BatchNorm1d default


def _round_up(v, m):
    return (v + m - 1) // m * m


def _vmem_limit_bytes():
    """~15% headroom below physical VMEM (128 MiB v5e/v6e, 64 MiB v7x)."""
    try:
        cap = int(pltpu.get_tpu_info().vmem_capacity_bytes)
        if cap < 32 * 1024 * 1024:
            cap = 64 * 1024 * 1024
    except Exception:
        cap = 64 * 1024 * 1024
    return int(cap * 0.85)


# ----------------------------------------------------------------------------
# Fused Pallas kernel: grid = (layer, row_block)
# ----------------------------------------------------------------------------
def _make_fused_gcn_kernel(num_layers, out_channels, tm):
    """Kernel body.

    Refs (in order):
      adj_ref   : (tm, n_pad)   bf16   A_hat row strip for this row block
      x_ref     : (n_pad, pad)  bf16   padded input features (read once)
      w_ref     : (pad, pad)    bf16   BN-folded weight of the CURRENT layer
      b_ref     : (1, pad)      f32    BN-folded bias of the CURRENT layer
      wc_ref    : (pad, pad)    bf16   critic weight (resident)
      bc_ref    : (1, pad)      f32    critic bias   (resident)
      logp_ref  : (n_pad, pad)  f32    output: log_softmax of last conv
      xproj_ref : (n_pad, pad)  bf16   output: critic(x_feat)
      xfeat_ref : (n_pad, pad)  bf16   output: pre-ReLU layer L-2 activation
      x0feat_ref: (n_pad, pad)  bf16   output: pre-ReLU layer 0 activation
      act_ref   : (n_pad, pad)  bf16   scratch: current layer input (ReLU'd)
      xw_ref    : (n_pad, pad)  bf16   scratch: act @ W_l, hoisted per layer
    """

    def kernel(adj_ref, x_ref, w_ref, b_ref, wc_ref, bc_ref,
               logp_ref, xproj_ref, xfeat_ref, x0feat_ref,
               act_ref, xw_ref):
        l = pl.program_id(0)
        m = pl.program_id(1)
        row0 = pl.multiple_of(m * tm, tm)

        # Very first step: seed the activation scratch with the input features.
        @pl.when((l == 0) & (m == 0))
        def _():
            act_ref[...] = x_ref[...]

        # Layer prologue (first row block of every layer): hoist the feature
        # transform XW = act @ W_l once per layer into VMEM scratch.
        @pl.when(m == 0)
        def _():
            xw_ref[...] = jnp.dot(
                act_ref[...], w_ref[...],
                preferred_element_type=jnp.float32).astype(jnp.bfloat16)

        # Row-block body: h = A_hat[rows] @ XW + b   (BatchNorm folded into W, b).
        h = jnp.dot(adj_ref[...], xw_ref[...],
                    preferred_element_type=jnp.float32) + b_ref[...]

        # Hidden layers: ReLU (eval-mode dropout == identity) feeds next layer.
        # act rows for this block are only re-read at the NEXT layer's m == 0,
        # after every row block of this layer has been written -> in-place safe.
        @pl.when(l < num_layers - 1)
        def _():
            act_ref[pl.ds(row0, tm), :] = jnp.maximum(h, 0.0).astype(jnp.bfloat16)

        # Feature outputs are stored the moment they are produced.
        @pl.when(l == 0)
        def _():
            x0feat_ref[pl.ds(row0, tm), :] = h.astype(x0feat_ref.dtype)

        @pl.when(l == num_layers - 2)
        def _():
            xfeat_ref[pl.ds(row0, tm), :] = h.astype(xfeat_ref.dtype)
            proj = jnp.dot(h.astype(jnp.bfloat16), wc_ref[...],
                           preferred_element_type=jnp.float32) + bc_ref[...]
            xproj_ref[pl.ds(row0, tm), :] = proj.astype(xproj_ref.dtype)

        # Final layer: masked log_softmax over the real classes (f32 epilogue).
        @pl.when(l == num_layers - 1)
        def _():
            lane = jax.lax.broadcasted_iota(jnp.int32, h.shape, 1)
            logits = jnp.where(lane < out_channels, h, -1e30)   # scalar fill
            mmax = jnp.max(logits, axis=-1, keepdims=True)
            z = logits - mmax
            lse = jnp.log(jnp.sum(jnp.exp(z), axis=-1, keepdims=True))
            logp_ref[pl.ds(row0, tm), :] = z - lse

    return kernel


# ----------------------------------------------------------------------------
# Host-side parameter construction, BN folding and padding
# ----------------------------------------------------------------------------
def _pad2(a, rows, cols):
    assert a.shape[0] <= rows and a.shape[1] <= cols, (a.shape, rows, cols)
    return jnp.pad(a, ((0, rows - a.shape[0]), (0, cols - a.shape[1])))


def glorot(key, fan_in, fan_out):
    limit = jnp.sqrt(6.0 / (fan_in + fan_out))
    return jax.random.uniform(key, (fan_in, fan_out), jnp.float32, -limit, limit)


def init_gcn_params(key, in_channels, hidden_channels, out_channels,
                    num_layers, proj_channels):
    """Deterministic synthetic parameters mirroring GCN.__init__ shapes."""
    dims = [in_channels] + [hidden_channels] * (num_layers - 1) + [out_channels]
    params = {"convs": [], "bns": []}
    for i in range(num_layers):
        key, kw = jax.random.split(key)
        cin, cout = dims[i], dims[i + 1]
        params["convs"].append({"w": glorot(kw, cin, cout),
                                "b": jnp.zeros((1, cout), jnp.float32)})
        if i < num_layers - 1:                     # one BN per non-final conv
            key, kg, kb, km, kv = jax.random.split(key, 5)
            params["bns"].append({
                "gamma": 1.0 + 0.1 * jax.random.normal(kg, (1, cout), jnp.float32),
                "beta": 0.1 * jax.random.normal(kb, (1, cout), jnp.float32),
                "mean": 0.1 * jax.random.normal(km, (1, cout), jnp.float32),
                "var": jnp.abs(1.0 + 0.1 * jax.random.normal(kv, (1, cout),
                                                             jnp.float32)),
            })
    key, kc = jax.random.split(key)
    params["critic"] = {"w": glorot(kc, hidden_channels, proj_channels),
                        "b": jnp.zeros((1, proj_channels), jnp.float32)}
    return params


def fold_and_pad_params(params, pad):
    """Fold eval-mode BatchNorm into conv W/b, pad channels, stack per layer."""
    num_layers = len(params["convs"])
    ws, bs = [], []
    for i in range(num_layers):
        w = params["convs"][i]["w"]
        b = params["convs"][i]["b"]
        if i < num_layers - 1:
            bn = params["bns"][i]
            s = bn["gamma"] * jax.lax.rsqrt(bn["var"] + BN_EPS)   # (1, cout)
            w = w * s
            b = (b - bn["mean"]) * s + bn["beta"]
        ws.append(_pad2(w, pad, pad).astype(jnp.bfloat16))
        bs.append(_pad2(b, 1, pad).astype(jnp.float32))
    w_stack = jnp.stack(ws)                                   # (L, pad, pad) bf16
    b_stack = jnp.stack(bs)                                   # (L, 1,  pad)  f32
    wc = _pad2(params["critic"]["w"], pad, pad).astype(jnp.bfloat16)
    bc = _pad2(params["critic"]["b"], 1, pad).astype(jnp.float32)
    return w_stack, b_stack, wc, bc


def normalized_adjacency(key, n, avg_degree=4):
    """Dense symmetric A_hat = D^-1/2 (A + I) D^-1/2 (what cached GCNConv uses)."""
    a = (jax.random.uniform(key, (n, n)) < (avg_degree / n)).astype(jnp.float32)
    a = jnp.maximum(a, a.T)
    a = jnp.minimum(a + jnp.eye(n, dtype=jnp.float32), 1.0)
    d_inv_sqrt = jax.lax.rsqrt(jnp.sum(a, axis=1))
    return a * d_inv_sqrt[:, None] * d_inv_sqrt[None, :]


# ----------------------------------------------------------------------------
# Forward: one fused, row-tiled pallas_call
# ----------------------------------------------------------------------------
@functools.partial(jax.jit, static_argnames=("out_channels", "hidden_channels",
                                             "proj_channels", "tile_m"))
def gcn_forward(params, x, adj, *, out_channels, hidden_channels, proj_channels,
                tile_m=256):
    num_layers = len(params["convs"])
    # num_layers == 2 leaves x0_feat undefined in the PyTorch module as well.
    assert num_layers >= 3
    n, in_channels = x.shape

    # Channel padding: next multiple of 128 of the largest channel dim.
    pad = _round_up(max(in_channels, hidden_channels, out_channels,
                        proj_channels), LANE)
    # Row tile: 256 rows feeds the 256-wide MXUs on v6e/v7x; rows are padded
    # with zeros (zero adjacency rows/cols -> padded rows never pollute real ones).
    tm = min(tile_m, _round_up(n, LANE))
    n_pad = _round_up(n, tm)
    assert n_pad % tm == 0

    w_stack, b_stack, wc, bc = fold_and_pad_params(params, pad)
    adj_p = _pad2(adj, n_pad, n_pad).astype(jnp.bfloat16)
    x_p = _pad2(x, n_pad, pad).astype(jnp.bfloat16)

    kernel = _make_fused_gcn_kernel(num_layers, out_channels, tm)
    grid = (num_layers, n_pad // tm)
    const = lambda l, m: (0, 0)

    in_specs = [
        pl.BlockSpec((tm, n_pad), lambda l, m: (m, 0)),           # A_hat strip (streamed, double-buffered)
        pl.BlockSpec((n_pad, pad), const),                        # x (resident, read once)
        pl.BlockSpec((None, pad, pad), lambda l, m: (l, 0, 0)),   # W_l  (per-layer prefetch)
        pl.BlockSpec((None, 1, pad), lambda l, m: (l, 0, 0)),     # b_l
        pl.BlockSpec((pad, pad), const),                          # critic W (resident)
        pl.BlockSpec((1, pad), const),                            # critic b
    ]
    out_specs = (
        pl.BlockSpec((n_pad, pad), const),   # log_probs
        pl.BlockSpec((n_pad, pad), const),   # x_proj
        pl.BlockSpec((n_pad, pad), const),   # x_feat
        pl.BlockSpec((n_pad, pad), const),   # x0_feat
    )
    out_shape = (
        jax.ShapeDtypeStruct((n_pad, pad), jnp.float32),
        jax.ShapeDtypeStruct((n_pad, pad), jnp.bfloat16),
        jax.ShapeDtypeStruct((n_pad, pad), jnp.bfloat16),
        jax.ShapeDtypeStruct((n_pad, pad), jnp.bfloat16),
    )
    scratch_shapes = [
        pltpu.VMEM((n_pad, pad), jnp.bfloat16),   # act: current layer input
        pltpu.VMEM((n_pad, pad), jnp.bfloat16),   # xw : act @ W_l (hoisted)
    ]

    # Advisory cost estimate for XLA's scheduler.
    flops = int(num_layers * 2 * n_pad * pad * pad        # XW per layer
                + num_layers * 2 * n_pad * n_pad * pad    # A_hat @ XW per layer
                + 2 * n_pad * pad * pad)                  # critic
    bytes_accessed = int(num_layers * n_pad * n_pad * 2   # adj restreamed per layer
                         + n_pad * pad * 2                # x
                         + w_stack.size * 2 + b_stack.size * 4
                         + wc.size * 2 + bc.size * 4
                         + n_pad * pad * (4 + 3 * 2))     # outputs (f32 + 3*bf16)
    cost = pl.CostEstimate(flops=flops, transcendentals=int(n_pad * (pad + 1)),
                           bytes_accessed=bytes_accessed)

    log_p, x_proj, x_feat, x0_feat = pl.pallas_call(
        kernel,
        grid=grid,
        in_specs=in_specs,
        out_specs=out_specs,
        out_shape=out_shape,
        scratch_shapes=scratch_shapes,
        compiler_params=pltpu.CompilerParams(
            # Rows of one layer feed ALL rows of the next through the
            # VMEM-carried activation scratch, so both axes stay "arbitrary".
            dimension_semantics=("arbitrary", "arbitrary"),
            vmem_limit_bytes=_vmem_limit_bytes(),
        ),
        cost_estimate=cost,
    )(adj_p, x_p, w_stack, b_stack, wc, bc)

    return (log_p[:n, :out_channels],
            x_proj[:n, :proj_channels].astype(jnp.float32),
            x_feat[:n, :hidden_channels].astype(jnp.float32),
            x0_feat[:n, :hidden_channels].astype(jnp.float32))


# ----------------------------------------------------------------------------
# Pure-JAX f32 reference (for correctness check only)
# ----------------------------------------------------------------------------
def gcn_forward_ref(params, x, adj):
    num_layers = len(params["convs"])
    x_feat = x0_feat = None
    for i in range(num_layers - 1):
        conv, bn = params["convs"][i], params["bns"][i]
        h = adj @ (x @ conv["w"]) + conv["b"]
        h = ((h - bn["mean"]) * jax.lax.rsqrt(bn["var"] + BN_EPS)
             * bn["gamma"] + bn["beta"])
        if i == num_layers - 2:
            x_feat = h
        elif i == 0:
            x0_feat = h
        x = jnp.maximum(h, 0.0)
    last = params["convs"][-1]
    logits = adj @ (x @ last["w"]) + last["b"]
    log_probs = jax.nn.log_softmax(logits, axis=-1)
    x_proj = x_feat @ params["critic"]["w"] + params["critic"]["b"]
    return log_probs, x_proj, x_feat, x0_feat


# ----------------------------------------------------------------------------
# Main
# ----------------------------------------------------------------------------
if __name__ == "__main__":
    N = 384                 # nodes (not a multiple of the 256-row tile: exercises row padding)
    IN_CH = 16              # in_channels
    HID = 32                # hidden_channels
    OUT_CH = 8              # out_channels (num classes)
    NUM_LAYERS = 3
    PROJ = 16               # critic projection width

    root = jax.random.PRNGKey(0)
    k_x, k_adj, k_params = jax.random.split(root, 3)

    x = jax.random.normal(k_x, (N, IN_CH), jnp.float32)
    adj = normalized_adjacency(k_adj, N)
    params = init_gcn_params(k_params, IN_CH, HID, OUT_CH, NUM_LAYERS, PROJ)

    outs = gcn_forward(params, x, adj, out_channels=OUT_CH,
                       hidden_channels=HID, proj_channels=PROJ)
    log_probs, x_proj, x_feat, x0_feat = jax.block_until_ready(outs)

    assert log_probs.shape == (N, OUT_CH)
    assert x_proj.shape == (N, PROJ)
    assert x_feat.shape == (N, HID)
    assert x0_feat.shape == (N, HID)
    # log_softmax rows should sum to 1 in probability space.
    assert bool(jnp.allclose(jnp.sum(jnp.exp(log_probs), axis=-1), 1.0, atol=1e-4))

    # Compare against the pure-JAX f32 reference (bf16 MXU inputs -> loose tol).
    ref = gcn_forward_ref(params, x, adj)
    for got, want, name in zip((log_probs, x_proj, x_feat, x0_feat), ref,
                               ("log_probs", "x_proj", "x_feat", "x0_feat")):
        assert bool(jnp.allclose(got, want, atol=1e-1, rtol=1e-1)), name

    print("KERNEL_OK")
</pallas_src>

<mosaic_0001>
module attributes {stable_mosaic.version = 11 : i64} {
  func.func @kernel(%arg0: i32, %arg1: i32, %arg2: memref<256x512xbf16, #tpu.memory_space<vmem>>, %arg3: memref<512x128xbf16, #tpu.memory_space<vmem>>, %arg4: memref<1x128x128xbf16, #tpu.memory_space<vmem>>, %arg5: memref<1x1x128xf32, #tpu.memory_space<vmem>>, %arg6: memref<128x128xbf16, #tpu.memory_space<vmem>>, %arg7: memref<1x128xf32, #tpu.memory_space<vmem>>, %arg8: memref<512x128xf32, #tpu.memory_space<vmem>>, %arg9: memref<512x128xbf16, #tpu.memory_space<vmem>>, %arg10: memref<512x128xbf16, #tpu.memory_space<vmem>>, %arg11: memref<512x128xbf16, #tpu.memory_space<vmem>>, %arg12: memref<512x128xbf16, #tpu.memory_space<vmem>>, %arg13: memref<512x128xbf16, #tpu.memory_space<vmem>>) attributes {dimension_semantics = [#tpu.dimension_semantics<arbitrary>, #tpu.dimension_semantics<arbitrary>], iteration_bounds = array<i64: 3, 2>, scalar_prefetch = 0 : i64, scratch_operands = 2 : i64, tpu.core_type = #tpu.core_type<tc>, window_params = [{transform_indices = @transform_0, window_bounds = array<i64: 256, 512>}, {pipeline_mode = #tpu.pipeline_mode<synchronous>, transform_indices = @transform_1, window_bounds = array<i64: 512, 128>}, {transform_indices = @transform_2, window_bounds = array<i64: 1, 128, 128>}, {transform_indices = @transform_3, window_bounds = array<i64: 1, 1, 128>}, {pipeline_mode = #tpu.pipeline_mode<synchronous>, transform_indices = @transform_4, window_bounds = array<i64: 128, 128>}, {pipeline_mode = #tpu.pipeline_mode<synchronous>, transform_indices = @transform_5, window_bounds = array<i64: 1, 128>}, {pipeline_mode = #tpu.pipeline_mode<synchronous>, transform_indices = @transform_6, window_bounds = array<i64: 512, 128>}, {pipeline_mode = #tpu.pipeline_mode<synchronous>, transform_indices = @transform_7, window_bounds = array<i64: 512, 128>}, {pipeline_mode = #tpu.pipeline_mode<synchronous>, transform_indices = @transform_8, window_bounds = array<i64: 512, 128>}, {pipeline_mode = #tpu.pipeline_mode<synchronous>, transform_indices = @transform_9, window_bounds = array<i64: 512, 128>}]} {
    %c256_i32 = arith.constant 256 : i32
    %0 = arith.muli %arg1, %c256_i32 : i32
    %1 = tpu.assume_multiple %0, 256 : i32
    %c0_i32 = arith.constant 0 : i32
    %2 = arith.cmpi eq, %arg0, %c0_i32 : i32
    %c0_i32_0 = arith.constant 0 : i32
    %3 = arith.cmpi eq, %arg1, %c0_i32_0 : i32
    %4 = arith.andi %2, %3 : i1
    %5 = arith.extui %4 : i1 to i32
    %c0_i32_1 = arith.constant 0 : i32
    %6 = arith.cmpi ne, %5, %c0_i32_1 : i32
    scf.if %6 {
      %c0_16 = arith.constant 0 : index
      %c0_17 = arith.constant 0 : index
      %29 = vector.load %arg3[%c0_16, %c0_17] : memref<512x128xbf16, #tpu.memory_space<vmem>>, vector<512x128xbf16>
      %c0_18 = arith.constant 0 : index
      %c0_19 = arith.constant 0 : index
      %30 = vector.load %arg12[%c0_18, %c0_19] : memref<512x128xbf16, #tpu.memory_space<vmem>>, vector<512x128xbf16>
      tpu.vector_store %arg12[%c0_18, %c0_19], %29 {strides = array<i32>} : memref<512x128xbf16, #tpu.memory_space<vmem>>, vector<512x128xbf16>,
    } else {
    }
    %c0_i32_2 = arith.constant 0 : i32
    %7 = arith.cmpi eq, %arg1, %c0_i32_2 : i32
    %8 = arith.extui %7 : i1 to i32
    %c0_i32_3 = arith.constant 0 : i32
    %9 = arith.cmpi ne, %8, %c0_i32_3 : i32
    scf.if %9 {
      %c0_16 = arith.constant 0 : index
      %c0_17 = arith.constant 0 : index
      %29 = vector.load %arg12[%c0_16, %c0_17] : memref<512x128xbf16, #tpu.memory_space<vmem>>, vector<512x128xbf16>
      %c0_18 = arith.constant 0 : index
      %c0_19 = arith.constant 0 : index
      %c0_20 = arith.constant 0 : index
      %30 = vector.load %arg4[%c0_18, %c0_19, %c0_20] : memref<1x128x128xbf16, #tpu.memory_space<vmem>>, vector<1x128x128xbf16>
      %31 = vector.shape_cast %30 : vector<1x128x128xbf16> to vector<128x128xbf16>
      %cst_21 = arith.constant dense<0.000000e+00> : vector<512x128xf32>
      %32 = tpu.matmul %29, %31, %cst_21 {dimension_numbers = #tpu.dot_dimension_numbers<[1], [0], [0], [1], [0, 0, 1, 1], [], []>} : vector<512x128xbf16>, vector<128x128xbf16>, vector<512x128xf32> -> vector<512x128xf32>
      %33 = arith.truncf %32 : vector<512x128xf32> to vector<512x128xbf16>
      %c0_22 = arith.constant 0 : index
      %c0_23 = arith.constant 0 : index
      %34 = vector.load %arg13[%c0_22, %c0_23] : memref<512x128xbf16, #tpu.memory_space<vmem>>, vector<512x128xbf16>
      tpu.vector_store %arg13[%c0_22, %c0_23], %33 {strides = array<i32>} : memref<512x128xbf16, #tpu.memory_space<vmem>>, vector<512x128xbf16>,
    } else {
    }
    %c0 = arith.constant 0 : index
    %c0_4 = arith.constant 0 : index
    %10 = vector.load %arg2[%c0, %c0_4] : memref<256x512xbf16, #tpu.memory_space<vmem>>, vector<256x512xbf16>
    %c0_5 = arith.constant 0 : index
    %c0_6 = arith.constant 0 : index
    %11 = vector.load %arg13[%c0_5, %c0_6] : memref<512x128xbf16, #tpu.memory_space<vmem>>, vector<512x128xbf16>
    %cst = arith.constant dense<0.000000e+00> : vector<256x128xf32>
    %12 = tpu.matmul %10, %11, %cst {dimension_numbers = #tpu.dot_dimension_numbers<[1], [0], [0], [1], [0, 0, 1, 1], [], []>} : vector<256x512xbf16>, vector<512x128xbf16>, vector<256x128xf32> -> vector<256x128xf32>
    %c0_7 = arith.constant 0 : index
    %c0_8 = arith.constant 0 : index
    %c0_9 = arith.constant 0 : index
    %13 = vector.load %arg5[%c0_7, %c0_8, %c0_9] : memref<1x1x128xf32, #tpu.memory_space<vmem>>, vector<1x1x128xf32>
    %14 = vector.shape_cast %13 : vector<1x1x128xf32> to vector<1x128xf32>
    %15 = vector.broadcast %14 : vector<1x128xf32> to vector<256x128xf32>
    %16 = arith.addf %12, %15 : vector<256x128xf32>
    %c2_i32 = arith.constant 2 : i32
    %17 = arith.cmpi slt, %arg0, %c2_i32 : i32
    %18 = arith.extui %17 : i1 to i32
    %c0_i32_10 = arith.constant 0 : i32
    %19 = arith.cmpi ne, %18, %c0_i32_10 : i32
    scf.if %19 {
      %cst_16 = arith.constant 0.000000e+00 : f32
      %29 = vector.broadcast %cst_16 : f32 to vector<256x128xf32>
      %30 = arith.maximumf %16, %29 : vector<256x128xf32>
      %31 = arith.truncf %30 : vector<256x128xf32> to vector<256x128xbf16>
      %32 = arith.index_cast %1 : i32 to index
      %c0_17 = arith.constant 0 : index
      %33 = vector.load %arg12[%32, %c0_17] : memref<512x128xbf16, #tpu.memory_space<vmem>>, vector<256x128xbf16>
      tpu.vector_store %arg12[%32, %c0_17], %31 {strides = array<i32>} : memref<512x128xbf16, #tpu.memory_space<vmem>>, vector<256x128xbf16>,
    } else {
    }
    %c0_i32_11 = arith.constant 0 : i32
    %20 = arith.cmpi eq, %arg0, %c0_i32_11 : i32
    %21 = arith.extui %20 : i1 to i32
    %c0_i32_12 = arith.constant 0 : i32
    %22 = arith.cmpi ne, %21, %c0_i32_12 : i32
    scf.if %22 {
      %29 = arith.truncf %16 : vector<256x128xf32> to vector<256x128xbf16>
      %30 = arith.index_cast %1 : i32 to index
      %c0_16 = arith.constant 0 : index
      %31 = vector.load %arg11[%30, %c0_16] : memref<512x128xbf16, #tpu.memory_space<vmem>>, vector<256x128xbf16>
      tpu.vector_store %arg11[%30, %c0_16], %29 {strides = array<i32>} : memref<512x128xbf16, #tpu.memory_space<vmem>>, vector<256x128xbf16>,
    } else {
    }
    %c1_i32 = arith.constant 1 : i32
    %23 = arith.cmpi eq, %arg0, %c1_i32 : i32
    %24 = arith.extui %23 : i1 to i32
    %c0_i32_13 = arith.constant 0 : i32
    %25 = arith.cmpi ne, %24, %c0_i32_13 : i32
    scf.if %25 {
      %29 = arith.truncf %16 : vector<256x128xf32> to vector<256x128xbf16>
      %30 = arith.index_cast %1 : i32 to index
      %c0_16 = arith.constant 0 : index
      %31 = vector.load %arg10[%30, %c0_16] : memref<512x128xbf16, #tpu.memory_space<vmem>>, vector<256x128xbf16>
      tpu.vector_store %arg10[%30, %c0_16], %29 {strides = array<i32>} : memref<512x128xbf16, #tpu.memory_space<vmem>>, vector<256x128xbf16>,
      %32 = arith.truncf %16 : vector<256x128xf32> to vector<256x128xbf16>
      %c0_17 = arith.constant 0 : index
      %c0_18 = arith.constant 0 : index
      %33 = vector.load %arg6[%c0_17, %c0_18] : memref<128x128xbf16, #tpu.memory_space<vmem>>, vector<128x128xbf16>
      %cst_19 = arith.constant dense<0.000000e+00> : vector<256x128xf32>
      %34 = tpu.matmul %32, %33, %cst_19 {dimension_numbers = #tpu.dot_dimension_numbers<[1], [0], [0], [1], [0, 0, 1, 1], [], []>} : vector<256x128xbf16>, vector<128x128xbf16>, vector<256x128xf32> -> vector<256x128xf32>
      %c0_20 = arith.constant 0 : index
      %c0_21 = arith.constant 0 : index
      %35 = vector.load %arg7[%c0_20, %c0_21] : memref<1x128xf32, #tpu.memory_space<vmem>>, vector<1x128xf32>
      %36 = vector.broadcast %35 : vector<1x128xf32> to vector<256x128xf32>
      %37 = arith.addf %34, %36 : vector<256x128xf32>
      %38 = arith.truncf %37 : vector<256x128xf32> to vector<256x128xbf16>
      %39 = arith.index_cast %1 : i32 to index
      %c0_22 = arith.constant 0 : index
      %40 = vector.load %arg9[%39, %c0_22] : memref<512x128xbf16, #tpu.memory_space<vmem>>, vector<256x128xbf16>
      tpu.vector_store %arg9[%39, %c0_22], %38 {strides = array<i32>} : memref<512x128xbf16, #tpu.memory_space<vmem>>, vector<256x128xbf16>,
    } else {
    }
    %c2_i32_14 = arith.constant 2 : i32
    %26 = arith.cmpi eq, %arg0, %c2_i32_14 : i32
    %27 = arith.extui %26 : i1 to i32
    %c0_i32_15 = arith.constant 0 : i32
    %28 = arith.cmpi ne, %27, %c0_i32_15 : i32
    scf.if %28 {
      %29 = tpu.iota {dimensions = array<i32: 1>} : vector<256x128xi32>
      %c8_i32 = arith.constant 8 : i32
      %30 = vector.broadcast %c8_i32 : i32 to vector<256x128xi32>
      %31 = arith.cmpi slt, %29, %30 : vector<256x128xi32>
      %cst_16 = arith.constant -1.000000e+30 : f32
      %32 = vector.broadcast %cst_16 : f32 to vector<256x128xf32>
      %33 = arith.select %31, %16, %32 : vector<256x128xi1>, vector<256x128xf32>
      %cst_17 = arith.constant dense<0xFF800000> : vector<256xf32>
      %34 = vector.multi_reduction <maximumf>, %33, %cst_17 [1] : vector<256x128xf32> to vector<256xf32>
      %35 = vector.shape_cast %34 : vector<256xf32> to vector<256x1xf32>
      %36 = vector.broadcast %35 : vector<256x1xf32> to vector<256x128xf32>
      %37 = arith.subf %33, %36 : vector<256x128xf32>
      %38 = math.exp %37 : vector<256x128xf32>
      %cst_18 = arith.constant dense<0.000000e+00> : vector<256xf32>
      %39 = vector.multi_reduction <add>, %38, %cst_18 [1] : vector<256x128xf32> to vector<256xf32>
      %40 = vector.shape_cast %39 : vector<256xf32> to vector<256x1xf32>
      %41 = math.log %40 : vector<256x1xf32>
      %42 = vector.broadcast %41 : vector<256x1xf32> to vector<256x128xf32>
      %43 = arith.subf %37, %42 : vector<256x128xf32>
      %44 = arith.index_cast %1 : i32 to index
      %c0_19 = arith.constant 0 : index
      %45 = vector.load %arg8[%44, %c0_19] : memref<512x128xf32, #tpu.memory_space<vmem>>, vector<256x128xf32>
      tpu.vector_store %arg8[%44, %c0_19], %43 {strides = array<i32>} : memref<512x128xf32, #tpu.memory_space<vmem>>, vector<256x128xf32>,
    } else {
    }
    return
  }
  func.func @transform_0(%arg0: i32, %arg1: i32) -> (i32, i32) {
    %c0_i32 = arith.constant 0 : i32
    %c0_i32_0 = arith.constant 0 : i32
    return %arg1, %c0_i32 : i32, i32
  }
  func.func @transform_1(%arg0: i32, %arg1: i32) -> (i32, i32) {
    %c0_i32 = arith.constant 0 : i32
    %c0_i32_0 = arith.constant 0 : i32
    %c0_i32_1 = arith.constant 0 : i32
    return %c0_i32, %c0_i32_0 : i32, i32
  }
  func.func @transform_2(%arg0: i32, %arg1: i32) -> (i32, i32, i32) {
    %c0_i32 = arith.constant 0 : i32
    %c0_i32_0 = arith.constant 0 : i32
    %c0_i32_1 = arith.constant 0 : i32
    return %arg0, %c0_i32, %c0_i32_0 : i32, i32, i32
  }
  func.func @transform_3(%arg0: i32, %arg1: i32) -> (i32, i32, i32) {
    %c0_i32 = arith.constant 0 : i32
    %c0_i32_0 = arith.constant 0 : i32
    %c0_i32_1 = arith.constant 0 : i32
    return %arg0, %c0_i32, %c0_i32_0 : i32, i32, i32
  }
  func.func @transform_4(%arg0: i32, %arg1: i32) -> (i32, i32) {
    %c0_i32 = arith.constant 0 : i32
    %c0_i32_0 = arith.constant 0 : i32
    %c0_i32_1 = arith.constant 0 : i32
    return %c0_i32, %c0_i32_0 : i32, i32
  }
  func.func @transform_5(%arg0: i32, %arg1: i32) -> (i32, i32) {
    %c0_i32 = arith.constant 0 : i32
    %c0_i32_0 = arith.constant 0 : i32
    %c0_i32_1 = arith.constant 0 : i32
    return %c0_i32, %c0_i32_0 : i32, i32
  }
  func.func @transform_6(%arg0: i32, %arg1: i32) -> (i32, i32) {
    %c0_i32 = arith.constant 0 : i32
    %c0_i32_0 = arith.constant 0 : i32
    %c0_i32_1 = arith.constant 0 : i32
    return %c0_i32, %c0_i32_0 : i32, i32
  }
  func.func @transform_7(%arg0: i32, %arg1: i32) -> (i32, i32) {
    %c0_i32 = arith.constant 0 : i32
    %c0_i32_0 = arith.constant 0 : i32
    %c0_i32_1 = arith.constant 0 : i32
    return %c0_i32, %c0_i32_0 : i32, i32
  }
  func.func @transform_8(%arg0: i32, %arg1: i32) -> (i32, i32) {
    %c0_i32 = arith.constant 0 : i32
    %c0_i32_0 = arith.constant 0 : i32
    %c0_i32_1 = arith.constant 0 : i32
    return %c0_i32, %c0_i32_0 : i32, i32
  }
  func.func @transform_9(%arg0: i32, %arg1: i32) -> (i32, i32) {
    %c0_i32 = arith.constant 0 : i32
    %c0_i32_0 = arith.constant 0 : i32
    %c0_i32_1 = arith.constant 0 : i32
    return %c0_i32, %c0_i32_0 : i32, i32
  }
}

</mosaic_0001>

<bundles_post_ra>
// kernel: gcn_forward.1
= control target key start
LH: loop header
LB: loop body
LE: loop exit
PB: predicated region body
PF: predicated region fallthrough
CT: control target
= control target key end

     0   :  { %s4599_s30 = smov 0   ;;  %s4601_s10 = smov 0   ;;  %s5605_s0 = inlined_call_operand.vmem [shape: bf16[512,512], index: 0, kind: input, shape index: {}]   ;;  %s5606_s1 = inlined_call_operand.vmem [shape: bf16[512,128], index: 1, kind: input, shape index: {}]   ;;  %s5607_s2 = inlined_call_operand.vmem [shape: bf16[3,128,128], index: 2, kind: input, shape index: {}]   ;;  %s5608_s3 = inlined_call_operand.vmem [shape: f32[3,1,128], index: 3, kind: input, shape index: {}]   ;;  %s5609_s4 = inlined_call_operand.vmem [shape: bf16[128,128], index: 4, kind: input, shape index: {}]   ;;  %s5610_s5 = inlined_call_operand.vmem [shape: f32[1,128], index: 5, kind: input, shape index: {}]   ;;  %s5611_s6 = inlined_call_operand.vmem [shape: f32[512,128], index: 6, kind: output, shape index: {0}]   ;;  %s5612_s7 = inlined_call_operand.vmem [shape: bf16[512,128], index: 7, kind: output, shape index: {1}]   ;;  %s5613_s8 = inlined_call_operand.vmem [shape: bf16[512,128], index: 8, kind: output, shape index: {2}]   ;;  %s5614_s9 = inlined_call_operand.vmem [shape: bf16[512,128], index: 9, kind: output, shape index: {3}]  }
   0x1   :  { %s4603_s11 = smov 0   ;;  %s4605_s12 = smov 0  }
   0x2   :  { %s4607_s13 = smov 0  }
   0x3 LB: > { %s29_s14 = sadd.s32 1, %s4539_s11  ;;  %s32_s15 = sadd.s32 1, %s4543_s12  ;;  %s4547_s13 = sphi %s4607_s13, %s20_s13   ;;  %s4543_s12 = sphi %s4605_s12, %s5622_s12   ;;  %s4539_s11 = sphi %s4603_s11, %s5621_s11   ;;  %s4535_s10 = sphi %s4601_s10, %s5620_s10   ;;  %s4531_s30 = sphi %s4599_s30, %s5619_s30  }
   0x4   : > { %p30_p0 = scmp.ge.s32.totalorder %s29_s14, 2  ;;  %p3138_p1 = scmp.ge.s32.totalorder %s4547_s13, 1 }
   0x5   : > { %p306_p2 = scmp.lt.s32.totalorder %s4547_s13, 7 }
   0x6   : > { %s5624_s14 = smov (%p30_p0, %s29_s14), 0  ;;  %s5626_s15 = smov (!%p30_p0, %s32_s15), %s4543_s12 }
   0x7   : > { %5615 = sst [smem:[#allocation4_spill]] %s5624_s14  ;;  %p307_p3 = pnand %p3138_p1, %p306_p2 }
   0x8   : > { %p34_p4 = scmp.ge.s32.totalorder %s5626_s15, 3  ;;  %s3139_s16 = sshll.u32 (!%p307_p3), %s4531_s30, 5 }
   0x9   : > { %310 = sbr.rel (%p307_p3) target bundleno = 1400 (0x578), region = 44  ;;  %p353_p5 = scmp.lt.s32.totalorder (!%p307_p3), %s4535_s10, 2 }
   0xa   : > { %s5628_s15 = smov (%p34_p4, %s5626_s15), 0  ;;  %p347_p6 = scmp.lt.s32.totalorder (!%p307_p3), %s3139_s16, 63 }
   0xb   : > { %5616 = sst [smem:[#allocation5_spill]] %s5628_s15  ;;  %s4636_s17 = sshll.u32 (!%p307_p3), %s4531_s30, 8 }
   0xc   : > { %p363_p7 = scmp.eq.s32.totalorder (!%p307_p3), %s4535_s10, 0  ;;  %p364_p8 = scmp.eq.s32.totalorder (!%p307_p3), %s4531_s30, 0 }
   0xe   : > { %p365_p9 = pnand (!%p307_p3), %p364_p8, %p363_p7 }
  0x10   : > { %s4639_s18 = scalar_select %p353_p5, %s4535_s10, 2 }
  0x11   : > { %s5630_s16 = smov (!%p347_p6, %s3139_s16), 63  ;;  %368 = sbr.rel (%p365_p9) target bundleno = 35 (0x23), region = 48 }
  0x12   : > { %s3367_s19 = sshll.u32 %s4639_s18, 6  ;;  %s360_s22 = scalar_lea.vmem %s5608_s3, %s4639_s18  ;;  %v4237_v0 = vld [vmem:[%s5606_s1] sm:$0xff] (!%p365_p9)   ;;  %v4238_v1 = vld [vmem:[%s5606_s1 + $0x8] sm:$0xff] (!%p365_p9)   ;;  %v4239_v2 = vld [vmem:[%s5606_s1 + $0x10] sm:$0xff] (!%p365_p9)  }
  0x13   : > { %s3366_s23 = sshll.u32 %s5630_s16, 4  ;;  %s4649_s26 = scalar_lea.vmem %s5607_s2, %s3367_s19  ;;  %625 = vst [vmem:[#allocation2] sm:$0xff] (!%p365_p9), %v4237_v0  ;;  %626 = vst [vmem:[#allocation2 + $0x8] sm:$0xff] (!%p365_p9), %v4238_v1  ;;  %v4240_v3 = vld [vmem:[%s5606_s1 + $0x18] sm:$0xff] (!%p365_p9)   ;;  %v4241_v4 = vld [vmem:[%s5606_s1 + $0x20] sm:$0xff] (!%p365_p9)  }
  0x14   : > { %s4654_s29 = scalar_lea.vmem %s5605_s0, %s3366_s23  ;;  %627 = vst [vmem:[#allocation2 + $0x10] sm:$0xff] (!%p365_p9), %v4239_v2  ;;  %628 = vst [vmem:[#allocation2 + $0x18] sm:$0xff] (!%p365_p9), %v4240_v3  ;;  %v4242_v5 = vld [vmem:[%s5606_s1 + $0x28] sm:$0xff] (!%p365_p9)   ;;  %v4243_v6 = vld [vmem:[%s5606_s1 + $0x30] sm:$0xff] (!%p365_p9)  }
  0x15   : > { %629 = vst [vmem:[#allocation2 + $0x20] sm:$0xff] (!%p365_p9), %v4241_v4  ;;  %630 = vst [vmem:[#allocation2 + $0x28] sm:$0xff] (!%p365_p9), %v4242_v5  ;;  %v4244_v7 = vld [vmem:[%s5606_s1 + $0x38] sm:$0xff] (!%p365_p9)   ;;  %v4245_v8 = vld [vmem:[%s5606_s1 + $0x40] sm:$0xff] (!%p365_p9)  }
  0x16   : > { %631 = vst [vmem:[#allocation2 + $0x30] sm:$0xff] (!%p365_p9), %v4243_v6  ;;  %632 = vst [vmem:[#allocation2 + $0x38] sm:$0xff] (!%p365_p9), %v4244_v7  ;;  %v4246_v9 = vld [vmem:[%s5606_s1 + $0x48] sm:$0xff] (!%p365_p9)   ;;  %v4247_v10 = vld [vmem:[%s5606_s1 + $0x50] sm:$0xff] (!%p365_p9)  }
  0x17   : > { %633 = vst [vmem:[#allocation2 + $0x40] sm:$0xff] (!%p365_p9), %v4245_v8  ;;  %634 = vst [vmem:[#allocation2 + $0x48] sm:$0xff] (!%p365_p9), %v4246_v9  ;;  %v4248_v11 = vld [vmem:[%s5606_s1 + $0x58] sm:$0xff] (!%p365_p9)   ;;  %v4249_v12 = vld [vmem:[%s5606_s1 + $0x60] sm:$0xff] (!%p365_p9)  }
  0x18   : > { %635 = vst [vmem:[#allocation2 + $0x50] sm:$0xff] %v4247_v10  ;;  %636 = vst [vmem:[#allocation2 + $0x58] sm:$0xff] %v4248_v11  ;;  %v4250_v13 = vld [vmem:[%s5606_s1 + $0x68] sm:$0xff]   ;;  %v4251_v14 = vld [vmem:[%s5606_s1 + $0x70] sm:$0xff]  }
  0x19   : > { %637 = vst [vmem:[#allocation2 + $0x60] sm:$0xff] %v4249_v12  ;;  %638 = vst [vmem:[#allocation2 + $0x68] sm:$0xff] %v4250_v13  ;;  %v4252_v15 = vld [vmem:[%s5606_s1 + $0x78] sm:$0xff]   ;;  %v4253_v16 = vld [vmem:[%s5606_s1 + $0x80] sm:$0xff]  }
  0x1a   : > { %639 = vst [vmem:[#allocation2 + $0x70] sm:$0xff] %v4251_v14  ;;  %640 = vst [vmem:[#allocation2 + $0x78] sm:$0xff] %v4252_v15  ;;  %v4254_v17 = vld [vmem:[%s5606_s1 + $0x88] sm:$0xff]   ;;  %v4255_v18 = vld [vmem:[%s5606_s1 + $0x90] sm:$0xff]  }
  0x1b   : > { %641 = vst [vmem:[#allocation2 + $0x80] sm:$0xff] %v4253_v16  ;;  %642 = vst [vmem:[#allocation2 + $0x88] sm:$0xff] %v4254_v17  ;;  %v4256_v19 = vld [vmem:[%s5606_s1 + $0x98] sm:$0xff]   ;;  %v4257_v20 = vld [vmem:[%s5606_s1 + $0xa0] sm:$0xff]  }
  0x1c   : > { %643 = vst [vmem:[#allocation2 + $0x90] sm:$0xff] %v4255_v18  ;;  %644 = vst [vmem:[#allocation2 + $0x98] sm:$0xff] %v4256_v19  ;;  %v4258_v21 = vld [vmem:[%s5606_s1 + $0xa8] sm:$0xff]   ;;  %v4259_v22 = vld [vmem:[%s5606_s1 + $0xb0] sm:$0xff]  }
  0x1d   : > { %645 = vst [vmem:[#allocation2 + $0xa0] sm:$0xff] %v4257_v20  ;;  %646 = vst [vmem:[#allocation2 + $0xa8] sm:$0xff] %v4258_v21  ;;  %v4260_v23 = vld [vmem:[%s5606_s1 + $0xb8] sm:$0xff]   ;;  %v4261_v24 = vld [vmem:[%s5606_s1 + $0xc0] sm:$0xff]  }
  0x1e   : > { %647 = vst [vmem:[#allocation2 + $0xb0] sm:$0xff] %v4259_v22  ;;  %648 = vst [vmem:[#allocation2 + $0xb8] sm:$0xff] %v4260_v23  ;;  %v4262_v25 = vld [vmem:[%s5606_s1 + $0xc8] sm:$0xff]   ;;  %v4263_v26 = vld [vmem:[%s5606_s1 + $0xd0] sm:$0xff]  }
  0x1f   : > { %649 = vst [vmem:[#allocation2 + $0xc0] sm:$0xff] %v4261_v24  ;;  %650 = vst [vmem:[#allocation2 + $0xc8] sm:$0xff] %v4262_v25  ;;  %v4264_v27 = vld [vmem:[%s5606_s1 + $0xd8] sm:$0xff]   ;;  %v4265_v28 = vld [vmem:[%s5606_s1 + $0xe0] sm:$0xff]  }
  0x20   : > { %651 = vst [vmem:[#allocation2 + $0xd0] sm:$0xff] %v4263_v26  ;;  %652 = vst [vmem:[#allocation2 + $0xd8] sm:$0xff] %v4264_v27  ;;  %v4266_v29 = vld [vmem:[%s5606_s1 + $0xe8] sm:$0xff]   ;;  %v4267_v30 = vld [vmem:[%s5606_s1 + $0xf0] sm:$0xff]  }
  0x21   : > { %653 = vst [vmem:[#allocation2 + $0xe0] sm:$0xff] %v4265_v28  ;;  %654 = vst [vmem:[#allocation2 + $0xe8] sm:$0xff] %v4266_v29  ;;  %v4268_v31 = vld [vmem:[%s5606_s1 + $0xf8] sm:$0xff]  }
  0x22   : > { %655 = vst [vmem:[#allocation2 + $0xf0] sm:$0xff] %v4267_v30  ;;  %656 = vst [vmem:[#allocation2 + $0xf8] sm:$0xff] %v4268_v31 }
  0x23 PF: > { %p3177_p10 = scmp.ne.s32.totalorder %s4531_s30, 0 }
  0x24   : > { %v4269_v32 = vld [vmem:[%s4649_s26] sm:$0xff] (!%p3177_p10)   ;;  %v4270_v33 = vld [vmem:[%s4649_s26 + $0x8] sm:$0xff] (!%p3177_p10)   ;;  %v4271_v34 = vld [vmem:[%s4649_s26 + $0x10] sm:$0xff] (!%p3177_p10)  }
  0x25   : > { %659 = sbr.rel (%p3177_p10) target bundleno = 343 (0x157), region = 52  ;;  %4037 = vmatprep.subr.bf16.mxu0 (!%p3177_p10), %v4269_v32  ;;  %4165 = vmatprep.subr.bf16.mxu1 (!%p3177_p10), %v4269_v32  ;;  %v4272_v35 = vld [vmem:[%s4649_s26 + $0x18] sm:$0xff] (!%p3177_p10)   ;;  %v660_v36 = vld [vmem:[#allocation2] sm:$0xff] (!%p3177_p10)  ;;  %v4274_v39 = vld [vmem:[%s4649_s26 + $0x28] sm:$0xff] (!%p3177_p10)  }
  0x26   : > { %4038 = vmatpush3.bf16.msra.mxu0 (!%p3177_p10), %v4269_v32  ;;  %4173 = vmatpush3.bf16.msra.mxu1 (!%p3177_p10), %v4269_v32  ;;  %v676_v37 = vld [vmem:[#allocation2 + $0x80] sm:$0xff] (!%p3177_p10)  ;;  %v4275_v40 = vld [vmem:[%s4649_s26 + $0x30] sm:$0xff] (!%p3177_p10)   ;;  %v4276_v41 = vld [vmem:[%s4649_s26 + $0x38] sm:$0xff] (!%p3177_p10)  }
  0x27   : > { %4039 = vmatprep.subr.bf16.mxu0 (!%p3177_p10), %v4270_v33  ;;  %4166 = vmatprep.subr.bf16.mxu1 (!%p3177_p10), %v4270_v33  ;;  %v4273_v38 = vld [vmem:[%s4649_s26 + $0x20] sm:$0xff] (!%p3177_p10)   ;;  %v661_v42 = vld [vmem:[#allocation2 + $0x8] sm:$0xff] (!%p3177_p10)  ;;  %v662_v44 = vld [vmem:[#allocation2 + $0x10] sm:$0xff] (!%p3177_p10) }
  0x28   : > { %4053 = vmatprep.mubr.bf16.mxu0 (!%p3177_p10), %v660_v36  ;;  %4085 = vmatprep.mubr.bf16.mxu1 (!%p3177_p10), %v676_v37  ;;  %v677_v43 = vld [vmem:[#allocation2 + $0x88] sm:$0xff] (!%p3177_p10)  ;;  %v678_v45 = vld [vmem:[#allocation2 + $0x90] sm:$0xff] (!%p3177_p10)  ;;  %v663_v46 = vld [vmem:[#allocation2 + $0x18] sm:$0xff] (!%p3177_p10) }
  0x29   : > { %v679_v47 = vld [vmem:[#allocation2 + $0x98] sm:$0xff] (!%p3177_p10)  ;;  %v664_v48 = vld [vmem:[#allocation2 + $0x20] sm:$0xff] (!%p3177_p10)  ;;  %v665_v50 = vld [vmem:[#allocation2 + $0x28] sm:$0xff] (!%p3177_p10) }
  0x2a   : > { %4040 = vmatpush3.bf16.msra.mxu0 (!%p3177_p10), %v4270_v33  ;;  %4174 = vmatpush3.bf16.msra.mxu1 (!%p3177_p10), %v4270_v33  ;;  %v680_v49 = vld [vmem:[#allocation2 + $0xa0] sm:$0xff] (!%p3177_p10)  ;;  %v681_v51 = vld [vmem:[#allocation2 + $0xa8] sm:$0xff] (!%p3177_p10)  ;;  %v666_v52 = vld [vmem:[#allocation2 + $0x30] sm:$0xff] (!%p3177_p10) }
  0x2b   : > { %4041 = vmatprep.subr.bf16.mxu0 (!%p3177_p10), %v4271_v34  ;;  %4167 = vmatprep.subr.bf16.mxu1 (!%p3177_p10), %v4271_v34  ;;  %v682_v53 = vld [vmem:[#allocation2 + $0xb0] sm:$0xff] (!%p3177_p10)  ;;  %v667_v54 = vld [vmem:[#allocation2 + $0x38] sm:$0xff] (!%p3177_p10)  ;;  %v668_v56 = vld [vmem:[#allocation2 + $0x40] sm:$0xff] (!%p3177_p10) }
  0x2c   : > { %v683_v55 = vld [vmem:[#allocation2 + $0xb8] sm:$0xff]  ;;  %v684_v57 = vld [vmem:[#allocation2 + $0xc0] sm:$0xff]  ;;  %v669_v58 = vld [vmem:[#allocation2 + $0x48] sm:$0xff] }
  0x2d   : > { %v685_v59 = vld [vmem:[#allocation2 + $0xc8] sm:$0xff]  ;;  %v670_v60 = vld [vmem:[#allocation2 + $0x50] sm:$0xff]  ;;  %v671_v62 = vld [vmem:[#allocation2 + $0x58] sm:$0xff] }
  0x2e   : > { %4042 = vmatpush3.bf16.msra.mxu0 %v4271_v34  ;;  %4175 = vmatpush3.bf16.msra.mxu1 %v4271_v34  ;;  %v686_v61 = vld [vmem:[#allocation2 + $0xd0] sm:$0xff]  ;;  %v687_v63 = vld [vmem:[#allocation2 + $0xd8] sm:$0xff]  ;;  %v672_v0 = vld [vmem:[#allocation2 + $0x60] sm:$0xff] }
  0x2f   : > { %4043 = vmatprep.subr.bf16.mxu0 %v4272_v35  ;;  %4168 = vmatprep.subr.bf16.mxu1 %v4272_v35  ;;  %v688_v1 = vld [vmem:[#allocation2 + $0xe0] sm:$0xff]  ;;  %v673_v2 = vld [vmem:[#allocation2 + $0x68] sm:$0xff]  ;;  %v674_v4 = vld [vmem:[#allocation2 + $0x70] sm:$0xff] }
  0x30   : > { %v689_v3 = vld [vmem:[#allocation2 + $0xe8] sm:$0xff]  ;;  %v690_v5 = vld [vmem:[#allocation2 + $0xf0] sm:$0xff]  ;;  %v675_v6 = vld [vmem:[#allocation2 + $0x78] sm:$0xff] }
  0x31   : > { %v691_v7 = vld [vmem:[#allocation2 + $0xf8] sm:$0xff] }
  0x32   : > { %4044 = vmatpush3.bf16.msra.mxu0 %v4272_v35  ;;  %4176 = vmatpush3.bf16.msra.mxu1 %v4272_v35 }
  0x33   : > { %4045 = vmatprep.subr.bf16.mxu0 %v4273_v38  ;;  %4169 = vmatprep.subr.bf16.mxu1 %v4273_v38 }
  0x36   : > { %4046 = vmatpush3.bf16.msra.mxu0 %v4273_v38  ;;  %4177 = vmatpush3.bf16.msra.mxu1 %v4273_v38 }
  0x37   : > { %4047 = vmatprep.subr.bf16.mxu0 %v4274_v39  ;;  %4170 = vmatprep.subr.bf16.mxu1 %v4274_v39 }
  0x3a   : > { %4048 = vmatpush3.bf16.msra.mxu0 %v4274_v39  ;;  %4178 = vmatpush3.bf16.msra.mxu1 %v4274_v39 }
  0x3b   : > { %4049 = vmatprep.subr.bf16.mxu0 %v4275_v40  ;;  %4171 = vmatprep.subr.bf16.mxu1 %v4275_v40 }
  0x3e   : > { %4050 = vmatpush3.bf16.msra.mxu0 %v4275_v40  ;;  %4179 = vmatpush3.bf16.msra.mxu1 %v4275_v40 }
  0x3f   : > { %4051 = vmatprep.subr.bf16.mxu0 %v4276_v41  ;;  %4172 = vmatprep.subr.bf16.mxu1 %v4276_v41 }
  0x42   : > { %4052 = vmatpush3.bf16.msra.mxu0 %v4276_v41  ;;  %4180 = vmatpush3.bf16.msra.mxu1 %v4276_v41 }
  0x45   : > { %4054 = vmatmul.mubr.bf16.vlgmr.msra.gmra.mrb[0].mxu0 %v661_v42  ;;  %4086 = vmatmul.mubr.bf16.vlgmr.msra.gmra.mrb[0].mxu1 %v677_v43 }
  0x46   : > { %4057 = vmatprep.mubr.bf16.mxu0 %v662_v44  ;;  %4089 = vmatprep.mubr.bf16.mxu1 %v678_v45 }
  0x4d   : > { %4058 = vmatmul.mubr.bf16.gmra.mrb[4].mxu0 %v663_v46  ;;  %4090 = vmatmul.mubr.bf16.gmra.mrb[4].mxu1 %v679_v47 }
  0x4e   : > { %4061 = vmatprep.mubr.bf16.mxu0 %v664_v48  ;;  %4093 = vmatprep.mubr.bf16.mxu1 %v680_v49 }
  0x55   : > { %4062 = vmatmul.mubr.bf16.gmra.mrb[8].mxu0 %v665_v50  ;;  %4094 = vmatmul.mubr.bf16.gmra.mrb[8].mxu1 %v681_v51 }
  0x56   : > { %4065 = vmatprep.mubr.bf16.mxu0 %v666_v52  ;;  %4097 = vmatprep.mubr.bf16.mxu1 %v682_v53 }
  0x5d   : > { %4066 = vmatmul.mubr.bf16.gmra.mrb[12].mxu0 %v667_v54  ;;  %4098 = vmatmul.mubr.bf16.gmra.mrb[12].mxu1 %v683_v55 }
  0x5e   : > { %4069 = vmatprep.mubr.bf16.mxu0 %v668_v56  ;;  %4101 = vmatprep.mubr.bf16.mxu1 %v684_v57 }
  0x65   : > { %4070 = vmatmul.mubr.bf16.gmra.mrb[16].mxu0 %v669_v58  ;;  %4102 = vmatmul.mubr.bf16.gmra.mrb[16].mxu1 %v685_v59 }
  0x66   : > { %4073 = vmatprep.mubr.bf16.mxu0 %v670_v60  ;;  %4105 = vmatprep.mubr.bf16.mxu1 %v686_v61 }
  0x6d   : > { %4074 = vmatmul.mubr.bf16.gmra.mrb[20].mxu0 %v671_v62  ;;  %4106 = vmatmul.mubr.bf16.gmra.mrb[20].mxu1 %v687_v63 }
  0x6e   : > { %4077 = vmatprep.mubr.bf16.mxu0 %v672_v0  ;;  %4109 = vmatprep.mubr.bf16.mxu1 %v688_v1 }
  0x75   : > { %4078 = vmatmul.mubr.bf16.gmra.mrb[24].mxu0 %v673_v2  ;;  %4110 = vmatmul.mubr.bf16.gmra.mrb[24].mxu1 %v689_v3 }
  0x76   : > { %4081 = vmatprep.mubr.bf16.mxu0 %v674_v4  ;;  %4113 = vmatprep.mubr.bf16.mxu1 %v690_v5 }
  0x7d   : > { %4082 = vmatmul.mubr.bf16.gmra.mrb[28].mxu0 %v675_v6  ;;  %4114 = vmatmul.mubr.bf16.gmra.mrb[28].mxu1 %v691_v7 }
 0x118   : > { %v4055_v8 = vpop.f32.mrb[0].mxu0  ;;  %v4087_v9 = vpop.f32.mrb[0].mxu1 }
 0x119   : > { %v790_v10 = vpop.f32.mrb[1].mxu0  ;;  %v918_v11 = vpop.f32.mrb[1].mxu1 }
 0x11a   : > { %v4056_v12 = vpop.f32.mrb[2].mxu0  ;;  %v4088_v13 = vpop.f32.mrb[2].mxu1 }
 0x11b   : > { %v1046_v14 = vpack.c.bf16 %v4056_v12, %v4055_v8  ;;  %v1062_v15 = vpack.c.bf16 %v4088_v13, %v4087_v9  ;;  %v793_v16 = vpop.f32.mrb[3].mxu0  ;;  %v921_v17 = vpop.f32.mrb[3].mxu1 }
 0x11c   : > { %v1045_v18 = vpack.c.bf16 %v793_v16, %v790_v10  ;;  %v1061_v19 = vpack.c.bf16 %v921_v17, %v918_v11 }
 0x11d   : > { %1078 = vst [vmem:[#allocation3 + $0x8] sm:$0xff] %v1046_v14  ;;  %1094 = vst [vmem:[#allocation3 + $0x88] sm:$0xff] %v1062_v15 }
 0x11e   : > { %1077 = vst [vmem:[#allocation3] sm:$0xff] %v1045_v18  ;;  %1093 = vst [vmem:[#allocation3 + $0x80] sm:$0xff] %v1061_v19 }
 0x120   : > { %v4059_v20 = vpop.f32.mrb[4].mxu0  ;;  %v4091_v21 = vpop.f32.mrb[4].mxu1 }
 0x121   : > { %v806_v22 = vpop.f32.mrb[5].mxu0  ;;  %v934_v23 = vpop.f32.mrb[5].mxu1 }
 0x122   : > { %v4060_v24 = vpop.f32.mrb[6].mxu0  ;;  %v4092_v25 = vpop.f32.mrb[6].mxu1 }
 0x123   : > { %v1048_v26 = vpack.c.bf16 %v4060_v24, %v4059_v20  ;;  %v1064_v27 = vpack.c.bf16 %v4092_v25, %v4091_v21  ;;  %v809_v28 = vpop.f32.mrb[7].mxu0  ;;  %v937_v29 = vpop.f32.mrb[7].mxu1 }
 0x124   : > { %v1047_v30 = vpack.c.bf16 %v809_v28, %v806_v22  ;;  %v1063_v31 = vpack.c.bf16 %v937_v29, %v934_v23 }
 0x125   : > { %1080 = vst [vmem:[#allocation3 + $0x18] sm:$0xff] %v1048_v26  ;;  %1096 = vst [vmem:[#allocation3 + $0x98] sm:$0xff] %v1064_v27 }
 0x126   : > { %1079 = vst [vmem:[#allocation3 + $0x10] sm:$0xff] %v1047_v30  ;;  %1095 = vst [vmem:[#allocation3 + $0x90] sm:$0xff] %v1063_v31 }
 0x128   : > { %v4063_v32 = vpop.f32.mrb[8].mxu0  ;;  %v4095_v33 = vpop.f32.mrb[8].mxu1 }
 0x129   : > { %v822_v34 = vpop.f32.mrb[9].mxu0  ;;  %v950_v35 = vpop.f32.mrb[9].mxu1 }
 0x12a   : > { %v4064_v36 = vpop.f32.mrb[10].mxu0  ;;  %v4096_v37 = vpop.f32.mrb[10].mxu1 }
 0x12b   : > { %v1050_v38 = vpack.c.bf16 %v4064_v36, %v4063_v32  ;;  %v1066_v39 = vpack.c.bf16 %v4096_v37, %v4095_v33  ;;  %v825_v40 = vpop.f32.mrb[11].mxu0  ;;  %v953_v41 = vpop.f32.mrb[11].mxu1 }
 0x12c   : > { %v1049_v42 = vpack.c.bf16 %v825_v40, %v822_v34  ;;  %v1065_v43 = vpack.c.bf16 %v953_v41, %v950_v35 }
 0x12d   : > { %1082 = vst [vmem:[#allocation3 + $0x28] sm:$0xff] %v1050_v38  ;;  %1098 = vst [vmem:[#allocation3 + $0xa8] sm:$0xff] %v1066_v39 }
 0x12e   : > { %1081 = vst [vmem:[#allocation3 + $0x20] sm:$0xff] %v1049_v42  ;;  %1097 = vst [vmem:[#allocation3 + $0xa0] sm:$0xff] %v1065_v43 }
 0x130   : > { %v4067_v44 = vpop.f32.mrb[12].mxu0  ;;  %v4099_v45 = vpop.f32.mrb[12].mxu1 }
 0x131   : > { %v838_v46 = vpop.f32.mrb[13].mxu0  ;;  %v966_v47 = vpop.f32.mrb[13].mxu1 }
 0x132   : > { %v4068_v48 = vpop.f32.mrb[14].mxu0  ;;  %v4100_v49 = vpop.f32.mrb[14].mxu1 }
 0x133   : > { %v1052_v50 = vpack.c.bf16 %v4068_v48, %v4067_v44  ;;  %v1068_v51 = vpack.c.bf16 %v4100_v49, %v4099_v45  ;;  %v841_v52 = vpop.f32.mrb[15].mxu0  ;;  %v969_v53 = vpop.f32.mrb[15].mxu1 }
 0x134   : > { %v1051_v54 = vpack.c.bf16 %v841_v52, %v838_v46  ;;  %v1067_v55 = vpack.c.bf16 %v969_v53, %v966_v47 }
 0x135   : > { %1084 = vst [vmem:[#allocation3 + $0x38] sm:$0xff] %v1052_v50  ;;  %1100 = vst [vmem:[#allocation3 + $0xb8] sm:$0xff] %v1068_v51 }
 0x136   : > { %1083 = vst [vmem:[#allocation3 + $0x30] sm:$0xff] %v1051_v54  ;;  %1099 = vst [vmem:[#allocation3 + $0xb0] sm:$0xff] %v1067_v55 }
 0x138   : > { %v4071_v56 = vpop.f32.mrb[16].mxu0  ;;  %v4103_v57 = vpop.f32.mrb[16].mxu1 }
 0x139   : > { %v854_v58 = vpop.f32.mrb[17].mxu0  ;;  %v982_v59 = vpop.f32.mrb[17].mxu1 }
 0x13a   : > { %v4072_v60 = vpop.f32.mrb[18].mxu0  ;;  %v4104_v61 = vpop.f32.mrb[18].mxu1 }
 0x13b   : > { %v1054_v62 = vpack.c.bf16 %v4072_v60, %v4071_v56  ;;  %v1070_v63 = vpack.c.bf16 %v4104_v61, %v4103_v57  ;;  %v857_v0 = vpop.f32.mrb[19].mxu0  ;;  %v985_v1 = vpop.f32.mrb[19].mxu1 }
 0x13c   : > { %v1053_v2 = vpack.c.bf16 %v857_v0, %v854_v58  ;;  %v1069_v3 = vpack.c.bf16 %v985_v1, %v982_v59 }
 0x13d   : > { %1086 = vst [vmem:[#allocation3 + $0x48] sm:$0xff] %v1054_v62  ;;  %1102 = vst [vmem:[#allocation3 + $0xc8] sm:$0xff] %v1070_v63 }
 0x13e   : > { %1085 = vst [vmem:[#allocation3 + $0x40] sm:$0xff] %v1053_v2  ;;  %1101 = vst [vmem:[#allocation3 + $0xc0] sm:$0xff] %v1069_v3 }
 0x140   : > { %v4075_v4 = vpop.f32.mrb[20].mxu0  ;;  %v4107_v5 = vpop.f32.mrb[20].mxu1 }
 0x141   : > { %v870_v6 = vpop.f32.mrb[21].mxu0  ;;  %v998_v7 = vpop.f32.mrb[21].mxu1 }
 0x142   : > { %v4076_v8 = vpop.f32.mrb[22].mxu0  ;;  %v4108_v9 = vpop.f32.mrb[22].mxu1 }
 0x143   : > { %v1056_v10 = vpack.c.bf16 %v4076_v8, %v4075_v4  ;;  %v1072_v11 = vpack.c.bf16 %v4108_v9, %v4107_v5  ;;  %v873_v12 = vpop.f32.mrb[23].mxu0  ;;  %v1001_v13 = vpop.f32.mrb[23].mxu1 }
 0x144   : > { %v1055_v14 = vpack.c.bf16 %v873_v12, %v870_v6  ;;  %v1071_v15 = vpack.c.bf16 %v1001_v13, %v998_v7 }
 0x145   : > { %1088 = vst [vmem:[#allocation3 + $0x58] sm:$0xff] %v1056_v10  ;;  %1104 = vst [vmem:[#allocation3 + $0xd8] sm:$0xff] %v1072_v11 }
 0x146   : > { %1087 = vst [vmem:[#allocation3 + $0x50] sm:$0xff] %v1055_v14  ;;  %1103 = vst [vmem:[#allocation3 + $0xd0] sm:$0xff] %v1071_v15 }
 0x148   : > { %v4079_v16 = vpop.f32.mrb[24].mxu0  ;;  %v4111_v17 = vpop.f32.mrb[24].mxu1 }
 0x149   : > { %v886_v18 = vpop.f32.mrb[25].mxu0  ;;  %v1014_v19 = vpop.f32.mrb[25].mxu1 }
 0x14a   : > { %v4080_v20 = vpop.f32.mrb[26].mxu0  ;;  %v4112_v21 = vpop.f32.mrb[26].mxu1 }
 0x14b   : > { %v1058_v22 = vpack.c.bf16 %v4080_v20, %v4079_v16  ;;  %v1074_v23 = vpack.c.bf16 %v4112_v21, %v4111_v17  ;;  %v889_v24 = vpop.f32.mrb[27].mxu0  ;;  %v1017_v25 = vpop.f32.mrb[27].mxu1 }
 0x14c   : > { %v1057_v26 = vpack.c.bf16 %v889_v24, %v886_v18  ;;  %v1073_v27 = vpack.c.bf16 %v1017_v25, %v1014_v19 }
 0x14d   : > { %1090 = vst [vmem:[#allocation3 + $0x68] sm:$0xff] %v1058_v22  ;;  %1106 = vst [vmem:[#allocation3 + $0xe8] sm:$0xff] %v1074_v23 }
 0x14e   : > { %1089 = vst [vmem:[#allocation3 + $0x60] sm:$0xff] %v1057_v26  ;;  %1105 = vst [vmem:[#allocation3 + $0xe0] sm:$0xff] %v1073_v27 }
 0x150   : > { %v4083_v28 = vpop.f32.mrb[28].mxu0  ;;  %v4115_v29 = vpop.f32.mrb[28].mxu1 }
 0x151   : > { %v902_v30 = vpop.f32.mrb[29].mxu0  ;;  %v1030_v31 = vpop.f32.mrb[29].mxu1 }
 0x152   : > { %v4084_v32 = vpop.f32.mrb[30].mxu0  ;;  %v4116_v33 = vpop.f32.mrb[30].mxu1 }
 0x153   : > { %v1060_v34 = vpack.c.bf16 %v4084_v32, %v4083_v28  ;;  %v1076_v35 = vpack.c.bf16 %v4116_v33, %v4115_v29  ;;  %v905_v36 = vpop.f32.mrb[31].mxu0  ;;  %v1033_v37 = vpop.f32.mrb[31].mxu1 }
 0x154   : > { %v1059_v38 = vpack.c.bf16 %v905_v36, %v902_v30  ;;  %v1075_v39 = vpack.c.bf16 %v1033_v37, %v1030_v31 }
 0x155   : > { %1092 = vst [vmem:[#allocation3 + $0x78] sm:$0xff] %v1060_v34  ;;  %1108 = vst [vmem:[#allocation3 + $0xf8] sm:$0xff] %v1076_v35 }
 0x156   : > { %1091 = vst [vmem:[#allocation3 + $0x70] sm:$0xff] %v1059_v38  ;;  %1107 = vst [vmem:[#allocation3 + $0xf0] sm:$0xff] %v1075_v39 }
 0x157 PF: > { %v1181_v40 = vld [vmem:[#allocation3 + $0x40] sm:$0xff]  ;;  %v1182_v44 = vld [vmem:[#allocation3 + $0x48] sm:$0xff]  ;;  %v1183_v48 = vld [vmem:[#allocation3 + $0x50] sm:$0xff]  ;;  %p3251_p11 = scmp.ge.s32.totalorder %s4535_s10, 2 }
 0x158   : > { %v1197_v41 = vld [vmem:[#allocation3 + $0xc0] sm:$0xff]  ;;  %3789 = vmatprep.subr.bf16.mxu0 %v1181_v40  ;;  %v1198_v45 = vld [vmem:[#allocation3 + $0xc8] sm:$0xff]  ;;  %v1199_v49 = vld [vmem:[#allocation3 + $0xd0] sm:$0xff]  ;;  %s1906_s18 = sshra.s32 (!%p3251_p11), %s4636_s17, 4 }
 0x159   : > { %v1173_v42 = vld [vmem:[#allocation3] sm:$0xff]  ;;  %3901 = vmatprep.subr.bf16.mxu1 %v1197_v41  ;;  %v1174_v46 = vld [vmem:[#allocation3 + $0x8] sm:$0xff]  ;;  %v1175_v50 = vld [vmem:[#allocation3 + $0x10] sm:$0xff] }
 0x15a   : > { %v1189_v43 = vld [vmem:[#allocation3 + $0x80] sm:$0xff]  ;;  %3790 = vmatpush3.bf16.msra.mxu0 %v1173_v42  ;;  %v1190_v47 = vld [vmem:[#allocation3 + $0x88] sm:$0xff]  ;;  %v1191_v51 = vld [vmem:[#allocation3 + $0x90] sm:$0xff] }
 0x15b   : > { %3902 = vmatpush3.bf16.msra.mxu1 %v1189_v43  ;;  %3791 = vmatprep.subr.bf16.mxu0 %v1182_v44  ;;  %v1184_v52 = vld [vmem:[#allocation3 + $0x58] sm:$0xff]  ;;  %v1185_v56 = vld [vmem:[#allocation3 + $0x60] sm:$0xff]  ;;  %v1186_v62 = vld [vmem:[#allocation3 + $0x68] sm:$0xff] }
 0x15c   : > { %3903 = vmatprep.subr.bf16.mxu1 %v1198_v45  ;;  %v1200_v53 = vld [vmem:[#allocation3 + $0xd8] sm:$0xff]  ;;  %v4279_v57 = vld [vmem:[%s4654_s29 + $0x4] ss:$16 sps:$4 sm:$0xff]   ;;  %v1202_v63 = vld [vmem:[#allocation3 + $0xe8] sm:$0xff] }
 0x15d   : > { %v1176_v54 = vld [vmem:[#allocation3 + $0x18] sm:$0xff]  ;;  %v1201_v58 = vld [vmem:[#allocation3 + $0xe0] sm:$0xff]  ;;  %1564 = vmatprep.mubr.bf16.mxu0 %v4279_v57  ;;  %v1178_v0 = vld [vmem:[#allocation3 + $0x28] sm:$0xff] }
 0x15e   : > { %3792 = vmatpush3.bf16.msra.mxu0 %v1174_v46  ;;  %v1192_v55 = vld [vmem:[#allocation3 + $0x98] sm:$0xff]  ;;  %v1177_v60 = vld [vmem:[#allocation3 + $0x20] sm:$0xff]  ;;  %v1194_v1 = vld [vmem:[#allocation3 + $0xa8] sm:$0xff] }
 0x15f   : > { %3904 = vmatpush3.bf16.msra.mxu1 %v1190_v47  ;;  %3793 = vmatprep.subr.bf16.mxu0 %v1183_v48  ;;  %v4282_v59 = vld [vmem:[%s4654_s29 + $0xc] ss:$16 sps:$4 sm:$0xff]   ;;  %v1193_v61 = vld [vmem:[#allocation3 + $0xa0] sm:$0xff]  ;;  %v1187_v2 = vld [vmem:[#allocation3 + $0x70] sm:$0xff] }
 0x160   : > { %3905 = vmatprep.subr.bf16.mxu1 %v1199_v49  ;;  %1725 = vmatprep.mubr.bf16.mxu1 %v4282_v59  ;;  %v1203_v3 = vld [vmem:[#allocation3 + $0xf0] sm:$0xff]  ;;  %v1188_v6 = vld [vmem:[#allocation3 + $0x78] sm:$0xff] }
 0x161   : > { %v1179_v4 = vld [vmem:[#allocation3 + $0x30] sm:$0xff]  ;;  %v1204_v7 = vld [vmem:[#allocation3 + $0xf8] sm:$0xff] }
 0x162   : > { %3794 = vmatpush3.bf16.msra.mxu0 %v1175_v50  ;;  %v1195_v5 = vld [vmem:[#allocation3 + $0xb0] sm:$0xff]  ;;  %v1180_v8 = vld [vmem:[#allocation3 + $0x38] sm:$0xff] }
 0x163   : > { %3906 = vmatpush3.bf16.msra.mxu1 %v1191_v51  ;;  %3795 = vmatprep.subr.bf16.mxu0 %v1184_v52  ;;  %v1196_v9 = vld [vmem:[#allocation3 + $0xb8] sm:$0xff]  ;;  %v4277_v10 = vld [vmem:[%s4654_s29] ss:$16 sps:$4 sm:$0xff]   ;;  %v4283_v12 = vld [vmem:[%s4654_s29 + $0x24] ss:$16 sps:$4 sm:$0xff]  }
 0x164   : > { %3907 = vmatprep.subr.bf16.mxu1 %v1200_v53  ;;  %v4280_v11 = vld [vmem:[%s4654_s29 + $0x8] ss:$16 sps:$4 sm:$0xff]   ;;  %v4285_v13 = vld [vmem:[%s4654_s29 + $0x2c] ss:$16 sps:$4 sm:$0xff]   ;;  %v4287_v14 = vld [vmem:[%s4654_s29 + $0x20] ss:$16 sps:$4 sm:$0xff]  }
 0x165   : > { %v4288_v15 = vld [vmem:[%s4654_s29 + $0x28] ss:$16 sps:$4 sm:$0xff]   ;;  %v4289_v16 = vld [vmem:[%s4654_s29 + $0x44] ss:$16 sps:$4 sm:$0xff]   ;;  %v4291_v17 = vld [vmem:[%s4654_s29 + $0x4c] ss:$16 sps:$4 sm:$0xff]  }
 0x166   : > { %3796 = vmatpush3.bf16.msra.mxu0 %v1176_v54  ;;  %v4293_v18 = vld [vmem:[%s4654_s29 + $0x40] ss:$16 sps:$4 sm:$0xff]   ;;  %v4294_v19 = vld [vmem:[%s4654_s29 + $0x48] ss:$16 sps:$4 sm:$0xff]   ;;  %v4295_v20 = vld [vmem:[%s4654_s29 + $0x64] ss:$16 sps:$4 sm:$0xff]  }
 0x167   : > { %3908 = vmatpush3.bf16.msra.mxu1 %v1192_v55  ;;  %3797 = vmatprep.subr.bf16.mxu0 %v1185_v56  ;;  %v4297_v21 = vld [vmem:[%s4654_s29 + $0x6c] ss:$16 sps:$4 sm:$0xff]   ;;  %v4299_v22 = vld [vmem:[%s4654_s29 + $0x60] ss:$16 sps:$4 sm:$0xff]   ;;  %v4300_v23 = vld [vmem:[%s4654_s29 + $0x68] ss:$16 sps:$4 sm:$0xff]  }
 0x168   : > { %3909 = vmatprep.subr.bf16.mxu1 %v1201_v58  ;;  %v4301_v24 = vld [vmem:[%s4654_s29 + $0x84] ss:$16 sps:$4 sm:$0xff]   ;;  %v4303_v25 = vld [vmem:[%s4654_s29 + $0x8c] ss:$16 sps:$4 sm:$0xff]   ;;  %v4305_v26 = vld [vmem:[%s4654_s29 + $0x80] ss:$16 sps:$4 sm:$0xff]  }
 0x169   : > { %v4306_v27 = vld [vmem:[%s4654_s29 + $0x88] ss:$16 sps:$4 sm:$0xff]   ;;  %v4307_v28 = vld [vmem:[%s4654_s29 + $0xa4] ss:$16 sps:$4 sm:$0xff]   ;;  %v4309_v29 = vld [vmem:[%s4654_s29 + $0xac] ss:$16 sps:$4 sm:$0xff]  }
 0x16a   : > { %3798 = vmatpush3.bf16.msra.mxu0 %v1177_v60  ;;  %v4311_v30 = vld [vmem:[%s4654_s29 + $0xa0] ss:$16 sps:$4 sm:$0xff]   ;;  %v4312_v31 = vld [vmem:[%s4654_s29 + $0xa8] ss:$16 sps:$4 sm:$0xff]   ;;  %v4313_v32 = vld [vmem:[%s4654_s29 + $0xc4] ss:$16 sps:$4 sm:$0xff]  }
 0x16b   : > { %3910 = vmatpush3.bf16.msra.mxu1 %v1193_v61  ;;  %3799 = vmatprep.subr.bf16.mxu0 %v1186_v62  ;;  %v4315_v33 = vld [vmem:[%s4654_s29 + $0xcc] ss:$16 sps:$4 sm:$0xff]   ;;  %v4317_v34 = vld [vmem:[%s4654_s29 + $0xc0] ss:$16 sps:$4 sm:$0xff]   ;;  %v4318_v35 = vld [vmem:[%s4654_s29 + $0xc8] ss:$16 sps:$4 sm:$0xff]  }
 0x16c   : > { %3911 = vmatprep.subr.bf16.mxu1 %v1202_v63  ;;  %v4319_v36 = vld [vmem:[%s4654_s29 + $0xe4] ss:$16 sps:$4 sm:$0xff]   ;;  %v4321_v37 = vld [vmem:[%s4654_s29 + $0xec] ss:$16 sps:$4 sm:$0xff]   ;;  %v4323_v38 = vld [vmem:[%s4654_s29 + $0xe0] ss:$16 sps:$4 sm:$0xff]  }
 0x16d   : > { %v4324_v39 = vld [vmem:[%s4654_s29 + $0xe8] ss:$16 sps:$4 sm:$0xff]   ;;  %v4325_v40 = vld [vmem:[%s4654_s29 + $0x104] ss:$16 sps:$4 sm:$0xff]   ;;  %v4327_v41 = vld [vmem:[%s4654_s29 + $0x10c] ss:$16 sps:$4 sm:$0xff]  }
 0x16e   : > { %3800 = vmatpush3.bf16.msra.mxu0 %v1178_v0  ;;  %v4329_v42 = vld [vmem:[%s4654_s29 + $0x100] ss:$16 sps:$4 sm:$0xff]   ;;  %v4330_v43 = vld [vmem:[%s4654_s29 + $0x108] ss:$16 sps:$4 sm:$0xff]   ;;  %v4331_v44 = vld [vmem:[%s4654_s29 + $0x124] ss:$16 sps:$4 sm:$0xff]  }
 0x16f   : > { %3912 = vmatpush3.bf16.msra.mxu1 %v1194_v1  ;;  %3801 = vmatprep.subr.bf16.mxu0 %v1187_v2  ;;  %v4333_v45 = vld [vmem:[%s4654_s29 + $0x12c] ss:$16 sps:$4 sm:$0xff]   ;;  %v4335_v46 = vld [vmem:[%s4654_s29 + $0x120] ss:$16 sps:$4 sm:$0xff]   ;;  %v4336_v47 = vld [vmem:[%s4654_s29 + $0x128] ss:$16 sps:$4 sm:$0xff]  }
 0x170   : > { %3913 = vmatprep.subr.bf16.mxu1 %v1203_v3  ;;  %v4337_v48 = vld [vmem:[%s4654_s29 + $0x144] ss:$16 sps:$4 sm:$0xff]   ;;  %v4339_v49 = vld [vmem:[%s4654_s29 + $0x14c] ss:$16 sps:$4 sm:$0xff]   ;;  %v4341_v50 = vld [vmem:[%s4654_s29 + $0x140] ss:$16 sps:$4 sm:$0xff]  }
 0x171   : > { %v4342_v51 = vld [vmem:[%s4654_s29 + $0x148] ss:$16 sps:$4 sm:$0xff]   ;;  %v4343_v52 = vld [vmem:[%s4654_s29 + $0x164] ss:$16 sps:$4 sm:$0xff]   ;;  %v4345_v53 = vld [vmem:[%s4654_s29 + $0x16c] ss:$16 sps:$4 sm:$0xff]  }
 0x172   : > { %3802 = vmatpush3.bf16.msra.mxu0 %v1179_v4  ;;  %v4347_v54 = vld [vmem:[%s4654_s29 + $0x160] ss:$16 sps:$4 sm:$0xff]   ;;  %v4348_v55 = vld [vmem:[%s4654_s29 + $0x168] ss:$16 sps:$4 sm:$0xff]   ;;  %v4349_v56 = vld [vmem:[%s4654_s29 + $0x184] ss:$16 sps:$4 sm:$0xff]  }
 0x173   : > { %3914 = vmatpush3.bf16.msra.mxu1 %v1195_v5  ;;  %3803 = vmatprep.subr.bf16.mxu0 %v1188_v6  ;;  %v4351_v57 = vld [vmem:[%s4654_s29 + $0x18c] ss:$16 sps:$4 sm:$0xff]   ;;  %v4353_v58 = vld [vmem:[%s4654_s29 + $0x180] ss:$16 sps:$4 sm:$0xff]   ;;  %v4354_v59 = vld [vmem:[%s4654_s29 + $0x188] ss:$16 sps:$4 sm:$0xff]  }
 0x174   : > { %3915 = vmatprep.subr.bf16.mxu1 %v1204_v7  ;;  %v4355_v60 = vld [vmem:[%s4654_s29 + $0x1a4] ss:$16 sps:$4 sm:$0xff]   ;;  %v4357_v61 = vld [vmem:[%s4654_s29 + $0x1ac] ss:$16 sps:$4 sm:$0xff]   ;;  %v4359_v62 = vld [vmem:[%s4654_s29 + $0x1a0] ss:$16 sps:$4 sm:$0xff]  }
 0x175   : > { %v4360_v63 = vld [vmem:[%s4654_s29 + $0x1a8] ss:$16 sps:$4 sm:$0xff]   ;;  %v4361_v0 = vld [vmem:[%s4654_s29 + $0x1c4] ss:$16 sps:$4 sm:$0xff]   ;;  %v4363_v1 = vld [vmem:[%s4654_s29 + $0x1cc] ss:$16 sps:$4 sm:$0xff]  }
 0x176   : > { %3804 = vmatpush3.bf16.msra.mxu0 %v1180_v8  ;;  %v4365_v2 = vld [vmem:[%s4654_s29 + $0x1c0] ss:$16 sps:$4 sm:$0xff]   ;;  %v4366_v3 = vld [vmem:[%s4654_s29 + $0x1c8] ss:$16 sps:$4 sm:$0xff]   ;;  %v4367_v4 = vld [vmem:[%s4654_s29 + $0x1e4] ss:$16 sps:$4 sm:$0xff]  }
 0x177   : > { %3916 = vmatpush3.bf16.msra.mxu1 %v1196_v9  ;;  %v4369_v5 = vld [vmem:[%s4654_s29 + $0x1ec] ss:$16 sps:$4 sm:$0xff]   ;;  %v4371_v6 = vld [vmem:[%s4654_s29 + $0x1e0] ss:$16 sps:$4 sm:$0xff]   ;;  %v4372_v7 = vld [vmem:[%s4654_s29 + $0x1e8] ss:$16 sps:$4 sm:$0xff]  }
 0x179   : > { %1565 = vmatmul.mubr.bf16.vlgmr.msra.gmra.mrb[0].mxu0 %v4277_v10  ;;  %v4832_v10 = vld [vmem:[%s360_s22] ss:$0 sm:$0xff]  ;;  %s3252_s22 = sshll.u32 (!%p3251_p11), %s1906_s18, 3 }
 0x17a   : > { %1726 = vmatmul.mubr.bf16.vlgmr.msra.gmra.mrb[0].mxu1 %v4280_v11  ;;  %1572 = vmatprep.mubr.bf16.mxu0 %v4283_v12  ;;  %s4944_s29 = scalar_lea.vmem (!%p3251_p11), [#allocation2], %s3252_s22 }
 0x17b   : > { %1733 = vmatprep.mubr.bf16.mxu1 %v4285_v13 }
 0x181   : > { %1573 = vmatmul.mubr.bf16.gmra.mrb[4].mxu0 %v4287_v14 }
 0x182   : > { %1734 = vmatmul.mubr.bf16.gmra.mrb[4].mxu1 %v4288_v15  ;;  %1580 = vmatprep.mubr.bf16.mxu0 %v4289_v16 }
 0x183   : > { %1741 = vmatprep.mubr.bf16.mxu1 %v4291_v17 }
 0x189   : > { %1581 = vmatmul.mubr.bf16.gmra.mrb[8].mxu0 %v4293_v18 }
 0x18a   : > { %1742 = vmatmul.mubr.bf16.gmra.mrb[8].mxu1 %v4294_v19  ;;  %1588 = vmatprep.mubr.bf16.mxu0 %v4295_v20 }
 0x18b   : > { %1749 = vmatprep.mubr.bf16.mxu1 %v4297_v21 }
 0x191   : > { %1589 = vmatmul.mubr.bf16.gmra.mrb[12].mxu0 %v4299_v22 }
 0x192   : > { %1750 = vmatmul.mubr.bf16.gmra.mrb[12].mxu1 %v4300_v23  ;;  %1596 = vmatprep.mubr.bf16.mxu0 %v4301_v24 }
 0x193   : > { %1757 = vmatprep.mubr.bf16.mxu1 %v4303_v25 }
 0x199   : > { %1597 = vmatmul.mubr.bf16.gmra.mrb[16].mxu0 %v4305_v26 }
 0x19a   : > { %1758 = vmatmul.mubr.bf16.gmra.mrb[16].mxu1 %v4306_v27  ;;  %1604 = vmatprep.mubr.bf16.mxu0 %v4307_v28 }
 0x19b   : > { %1765 = vmatprep.mubr.bf16.mxu1 %v4309_v29 }
 0x1a1   : > { %1605 = vmatmul.mubr.bf16.gmra.mrb[20].mxu0 %v4311_v30 }
 0x1a2   : > { %1766 = vmatmul.mubr.bf16.gmra.mrb[20].mxu1 %v4312_v31  ;;  %1612 = vmatprep.mubr.bf16.mxu0 %v4313_v32 }
 0x1a3   : > { %1773 = vmatprep.mubr.bf16.mxu1 %v4315_v33 }
 0x1a9   : > { %1613 = vmatmul.mubr.bf16.gmra.mrb[24].mxu0 %v4317_v34 }
 0x1aa   : > { %1774 = vmatmul.mubr.bf16.gmra.mrb[24].mxu1 %v4318_v35  ;;  %1620 = vmatprep.mubr.bf16.mxu0 %v4319_v36 }
 0x1ab   : > { %1781 = vmatprep.mubr.bf16.mxu1 %v4321_v37 }
 0x1b1   : > { %1621 = vmatmul.mubr.bf16.gmra.mrb[28].mxu0 %v4323_v38 }
 0x1b2   : > { %1782 = vmatmul.mubr.bf16.gmra.mrb[28].mxu1 %v4324_v39  ;;  %1628 = vmatprep.mubr.bf16.mxu0 %v4325_v40 }
 0x1b3   : > { %1789 = vmatprep.mubr.bf16.mxu1 %v4327_v41 }
 0x1b9   : > { %1629 = vmatmul.mubr.bf16.gmra.mrb[32].mxu0 %v4329_v42 }
 0x1ba   : > { %1790 = vmatmul.mubr.bf16.gmra.mrb[32].mxu1 %v4330_v43  ;;  %1636 = vmatprep.mubr.bf16.mxu0 %v4331_v44 }
 0x1bb   : > { %1797 = vmatprep.mubr.bf16.mxu1 %v4333_v45 }
 0x1c1   : > { %1637 = vmatmul.mubr.bf16.gmra.mrb[36].mxu0 %v4335_v46 }
 0x1c2   : > { %1798 = vmatmul.mubr.bf16.gmra.mrb[36].mxu1 %v4336_v47  ;;  %1644 = vmatprep.mubr.bf16.mxu0 %v4337_v48 }
 0x1c3   : > { %1805 = vmatprep.mubr.bf16.mxu1 %v4339_v49 }
 0x1c9   : > { %1645 = vmatmul.mubr.bf16.gmra.mrb[40].mxu0 %v4341_v50 }
 0x1ca   : > { %1806 = vmatmul.mubr.bf16.gmra.mrb[40].mxu1 %v4342_v51  ;;  %1652 = vmatprep.mubr.bf16.mxu0 %v4343_v52 }
 0x1cb   : > { %1813 = vmatprep.mubr.bf16.mxu1 %v4345_v53 }
 0x1d1   : > { %1653 = vmatmul.mubr.bf16.gmra.mrb[44].mxu0 %v4347_v54 }
 0x1d2   : > { %1814 = vmatmul.mubr.bf16.gmra.mrb[44].mxu1 %v4348_v55  ;;  %1660 = vmatprep.mubr.bf16.mxu0 %v4349_v56 }
 0x1d3   : > { %1821 = vmatprep.mubr.bf16.mxu1 %v4351_v57 }
 0x1d9   : > { %1661 = vmatmul.mubr.bf16.gmra.mrb[48].mxu0 %v4353_v58 }
 0x1da   : > { %1822 = vmatmul.mubr.bf16.gmra.mrb[48].mxu1 %v4354_v59  ;;  %1668 = vmatprep.mubr.bf16.mxu0 %v4355_v60 }
 0x1db   : > { %1829 = vmatprep.mubr.bf16.mxu1 %v4357_v61 }
 0x1e1   : > { %1669 = vmatmul.mubr.bf16.gmra.mrb[52].mxu0 %v4359_v62 }
 0x1e2   : > { %1830 = vmatmul.mubr.bf16.gmra.mrb[52].mxu1 %v4360_v63  ;;  %1676 = vmatprep.mubr.bf16.mxu0 %v4361_v0 }
 0x1e3   : > { %1837 = vmatprep.mubr.bf16.mxu1 %v4363_v1 }
 0x1e9   : > { %1677 = vmatmul.mubr.bf16.gmra.mrb[56].mxu0 %v4365_v2 }
 0x1ea   : > { %1838 = vmatmul.mubr.bf16.gmra.mrb[56].mxu1 %v4366_v3  ;;  %1684 = vmatprep.mubr.bf16.mxu0 %v4367_v4 }
 0x1eb   : > { %1845 = vmatprep.mubr.bf16.mxu1 %v4369_v5 }
 0x1f1   : > { %1685 = vmatmul.mubr.bf16.gmra.mrb[60].mxu0 %v4371_v6 }
 0x1f2   : > { %1846 = vmatmul.mubr.bf16.gmra.mrb[60].mxu1 %v4372_v7 }
 0x24c   : > { %v3805_v8 = vpop.f32.mrb[0].mxu0 }
 0x24d   : > { %v3917_v9 = vpop.f32.mrb[0].mxu1  ;;  %v3806_v11 = vpop.f32.mrb[1].mxu0 }
 0x24e   : > { %v3918_v12 = vpop.f32.mrb[1].mxu1  ;;  %v3807_v13 = vadd.f32 %v3806_v11, %v3805_v8  ;;  %v3808_v15 = vpop.f32.mrb[2].mxu0 }
 0x24f   : > { %v3919_v14 = vadd.f32 %v3918_v12, %v3917_v9  ;;  %v3920_v16 = vpop.f32.mrb[2].mxu1  ;;  %v3809_v17 = vpop.f32.mrb[3].mxu0 }
 0x250   : > { %v3921_v18 = vpop.f32.mrb[3].mxu1  ;;  %v1567_v19 = vadd.f32 %v3807_v13, %v4832_v10  ;;  %v3810_v20 = vadd.f32 %v3809_v17, %v3808_v15 }
 0x251   : > { %v3922_v21 = vadd.f32 %v3921_v18, %v3920_v16 }
 0x252   : > { %v4835_v22 = vadd.f32 %v3919_v14, %v1567_v19  ;;  %v1570_v23 = vadd.f32 %v3810_v20, %v4832_v10 }
 0x254   : > { %v4838_v24 = vadd.f32 %v3922_v21, %v1570_v23  ;;  %v3811_v25 = vpop.f32.mrb[4].mxu0 }
 0x255   : > { %v3923_v26 = vpop.f32.mrb[4].mxu1  ;;  %v3812_v27 = vpop.f32.mrb[5].mxu0 }
 0x256   : > { %v3924_v28 = vpop.f32.mrb[5].mxu1  ;;  %v3813_v29 = vadd.f32 %v3812_v27, %v3811_v25  ;;  %v3814_v31 = vpop.f32.mrb[6].mxu0 }
 0x257   : > { %v3925_v30 = vadd.f32 %v3924_v28, %v3923_v26  ;;  %v3926_v32 = vpop.f32.mrb[6].mxu1  ;;  %v3815_v33 = vpop.f32.mrb[7].mxu0 }
 0x258   : > { %v3927_v34 = vpop.f32.mrb[7].mxu1  ;;  %v1575_v35 = vadd.f32 %v3813_v29, %v4832_v10  ;;  %v3816_v36 = vadd.f32 %v3815_v33, %v3814_v31 }
 0x259   : > { %v3928_v37 = vadd.f32 %v3927_v34, %v3926_v32 }
 0x25a   : > { %v4841_v38 = vadd.f32 %v3925_v30, %v1575_v35  ;;  %v1578_v39 = vadd.f32 %v3816_v36, %v4832_v10 }
 0x25c   : > { %v4844_v40 = vadd.f32 %v3928_v37, %v1578_v39  ;;  %v3817_v41 = vpop.f32.mrb[8].mxu0 }
 0x25d   : > { %v3929_v42 = vpop.f32.mrb[8].mxu1  ;;  %v3818_v43 = vpop.f32.mrb[9].mxu0 }
 0x25e   : > { %v3930_v44 = vpop.f32.mrb[9].mxu1  ;;  %v3819_v45 = vadd.f32 %v3818_v43, %v3817_v41  ;;  %v3820_v47 = vpop.f32.mrb[10].mxu0 }
 0x25f   : > { %v3931_v46 = vadd.f32 %v3930_v44, %v3929_v42  ;;  %v3932_v48 = vpop.f32.mrb[10].mxu1  ;;  %v3821_v49 = vpop.f32.mrb[11].mxu0 }
 0x260   : > { %v3933_v50 = vpop.f32.mrb[11].mxu1  ;;  %v1583_v51 = vadd.f32 %v3819_v45, %v4832_v10  ;;  %v3822_v52 = vadd.f32 %v3821_v49, %v3820_v47 }
 0x261   : > { %v3934_v53 = vadd.f32 %v3933_v50, %v3932_v48 }
 0x262   : > { %v4847_v54 = vadd.f32 %v3931_v46, %v1583_v51  ;;  %v1586_v55 = vadd.f32 %v3822_v52, %v4832_v10 }
 0x264   : > { %v4850_v56 = vadd.f32 %v3934_v53, %v1586_v55  ;;  %v3823_v57 = vpop.f32.mrb[12].mxu0 }
 0x265   : > { %v3935_v58 = vpop.f32.mrb[12].mxu1  ;;  %v3824_v59 = vpop.f32.mrb[13].mxu0 }
 0x266   : > { %v3936_v60 = vpop.f32.mrb[13].mxu1  ;;  %v3825_v61 = vadd.f32 %v3824_v59, %v3823_v57  ;;  %v3826_v63 = vpop.f32.mrb[14].mxu0 }
 0x267   : > { %v3937_v62 = vadd.f32 %v3936_v60, %v3935_v58  ;;  %v3938_v0 = vpop.f32.mrb[14].mxu1  ;;  %v3827_v1 = vpop.f32.mrb[15].mxu0 }
 0x268   : > { %v3939_v2 = vpop.f32.mrb[15].mxu1  ;;  %v1591_v3 = vadd.f32 %v3825_v61, %v4832_v10  ;;  %v3828_v4 = vadd.f32 %v3827_v1, %v3826_v63 }
 0x269   : > { %v3940_v5 = vadd.f32 %v3939_v2, %v3938_v0 }
 0x26a   : > { %v4853_v6 = vadd.f32 %v3937_v62, %v1591_v3  ;;  %v1594_v7 = vadd.f32 %v3828_v4, %v4832_v10 }
 0x26c   : > { %v4856_v8 = vadd.f32 %v3940_v5, %v1594_v7  ;;  %v3829_v9 = vpop.f32.mrb[16].mxu0 }
 0x26d   : > { %v3941_v11 = vpop.f32.mrb[16].mxu1  ;;  %v3830_v12 = vpop.f32.mrb[17].mxu0 }
 0x26e   : > { %v3942_v13 = vpop.f32.mrb[17].mxu1  ;;  %v3831_v14 = vadd.f32 %v3830_v12, %v3829_v9  ;;  %v3832_v16 = vpop.f32.mrb[18].mxu0 }
 0x26f   : > { %v3943_v15 = vadd.f32 %v3942_v13, %v3941_v11  ;;  %v3944_v17 = vpop.f32.mrb[18].mxu1  ;;  %v3833_v18 = vpop.f32.mrb[19].mxu0 }
 0x270   : > { %v3945_v19 = vpop.f32.mrb[19].mxu1  ;;  %v1599_v20 = vadd.f32 %v3831_v14, %v4832_v10  ;;  %v3834_v21 = vadd.f32 %v3833_v18, %v3832_v16 }
 0x271   : > { %v3946_v23 = vadd.f32 %v3945_v19, %v3944_v17 }
 0x272   : > { %v4859_v25 = vadd.f32 %v3943_v15, %v1599_v20  ;;  %v1602_v26 = vadd.f32 %v3834_v21, %v4832_v10 }
 0x274   : > { %v4862_v27 = vadd.f32 %v3946_v23, %v1602_v26  ;;  %v3835_v28 = vpop.f32.mrb[20].mxu0 }
 0x275   : > { %v3947_v29 = vpop.f32.mrb[20].mxu1  ;;  %v3836_v30 = vpop.f32.mrb[21].mxu0 }
 0x276   : > { %v3948_v31 = vpop.f32.mrb[21].mxu1  ;;  %v3837_v32 = vadd.f32 %v3836_v30, %v3835_v28  ;;  %v3838_v34 = vpop.f32.mrb[22].mxu0 }
 0x277   : > { %v3949_v33 = vadd.f32 %v3948_v31, %v3947_v29  ;;  %v3950_v35 = vpop.f32.mrb[22].mxu1  ;;  %v3839_v36 = vpop.f32.mrb[23].mxu0 }
 0x278   : > { %v3951_v37 = vpop.f32.mrb[23].mxu1  ;;  %v1607_v39 = vadd.f32 %v3837_v32, %v4832_v10  ;;  %v3840_v41 = vadd.f32 %v3839_v36, %v3838_v34 }
 0x279   : > { %v3952_v42 = vadd.f32 %v3951_v37, %v3950_v35 }
 0x27a   : > { %v4865_v43 = vadd.f32 %v3949_v33, %v1607_v39  ;;  %v1610_v44 = vadd.f32 %v3840_v41, %v4832_v10 }
 0x27c   : > { %v4868_v45 = vadd.f32 %v3952_v42, %v1610_v44  ;;  %v3841_v46 = vpop.f32.mrb[24].mxu0 }
 0x27d   : > { %v3953_v47 = vpop.f32.mrb[24].mxu1  ;;  %v3842_v48 = vpop.f32.mrb[25].mxu0 }
 0x27e   : > { %v3954_v49 = vpop.f32.mrb[25].mxu1  ;;  %v3843_v50 = vadd.f32 %v3842_v48, %v3841_v46  ;;  %v3844_v52 = vpop.f32.mrb[26].mxu0 }
 0x27f   : > { %v3955_v51 = vadd.f32 %v3954_v49, %v3953_v47  ;;  %v3956_v53 = vpop.f32.mrb[26].mxu1  ;;  %v3845_v55 = vpop.f32.mrb[27].mxu0 }
 0x280   : > { %v3957_v57 = vpop.f32.mrb[27].mxu1  ;;  %v1615_v58 = vadd.f32 %v3843_v50, %v4832_v10  ;;  %v3846_v59 = vadd.f32 %v3845_v55, %v3844_v52 }
 0x281   : > { %v3958_v60 = vadd.f32 %v3957_v57, %v3956_v53 }
 0x282   : > { %v4871_v61 = vadd.f32 %v3955_v51, %v1615_v58  ;;  %v1618_v62 = vadd.f32 %v3846_v59, %v4832_v10 }
 0x284   : > { %v4874_v63 = vadd.f32 %v3958_v60, %v1618_v62  ;;  %v3847_v0 = vpop.f32.mrb[28].mxu0 }
 0x285   : > { %v3959_v1 = vpop.f32.mrb[28].mxu1  ;;  %v3848_v2 = vpop.f32.mrb[29].mxu0 }
 0x286   : > { %v3960_v3 = vpop.f32.mrb[29].mxu1  ;;  %v3849_v4 = vadd.f32 %v3848_v2, %v3847_v0  ;;  %v3850_v7 = vpop.f32.mrb[30].mxu0 }
 0x287   : > { %v3961_v5 = vadd.f32 %v3960_v3, %v3959_v1  ;;  %v3962_v9 = vpop.f32.mrb[30].mxu1  ;;  %v3851_v11 = vpop.f32.mrb[31].mxu0 }
 0x288   : > { %v3963_v12 = vpop.f32.mrb[31].mxu1  ;;  %v1623_v13 = vadd.f32 %v3849_v4, %v4832_v10  ;;  %v3852_v14 = vadd.f32 %v3851_v11, %v3850_v7 }
 0x289   : > { %v3964_v15 = vadd.f32 %v3963_v12, %v3962_v9 }
 0x28a   : > { %v4877_v16 = vadd.f32 %v3961_v5, %v1623_v13  ;;  %v1626_v17 = vadd.f32 %v3852_v14, %v4832_v10 }
 0x28c   : > { %v4880_v18 = vadd.f32 %v3964_v15, %v1626_v17  ;;  %v3853_v19 = vpop.f32.mrb[32].mxu0 }
 0x28d   : > { %v3965_v20 = vpop.f32.mrb[32].mxu1  ;;  %v3854_v21 = vpop.f32.mrb[33].mxu0 }
 0x28e   : > { %v3966_v23 = vpop.f32.mrb[33].mxu1  ;;  %v3855_v26 = vadd.f32 %v3854_v21, %v3853_v19  ;;  %v3856_v29 = vpop.f32.mrb[34].mxu0 }
 0x28f   : > { %v3967_v28 = vadd.f32 %v3966_v23, %v3965_v20  ;;  %v3968_v30 = vpop.f32.mrb[34].mxu1  ;;  %v3857_v31 = vpop.f32.mrb[35].mxu0 }
 0x290   : > { %v3969_v32 = vpop.f32.mrb[35].mxu1  ;;  %v1631_v33 = vadd.f32 %v3855_v26, %v4832_v10  ;;  %v3858_v34 = vadd.f32 %v3857_v31, %v3856_v29 }
 0x291   : > { %v3970_v35 = vadd.f32 %v3969_v32, %v3968_v30 }
 0x292   : > { %v4883_v36 = vadd.f32 %v3967_v28, %v1631_v33  ;;  %v1634_v37 = vadd.f32 %v3858_v34, %v4832_v10 }
 0x294   : > { %v4886_v39 = vadd.f32 %v3970_v35, %v1634_v37  ;;  %v3859_v41 = vpop.f32.mrb[36].mxu0 }
 0x295   : > { %v3971_v42 = vpop.f32.mrb[36].mxu1  ;;  %v3860_v44 = vpop.f32.mrb[37].mxu0 }
 0x296   : > { %v3972_v46 = vpop.f32.mrb[37].mxu1  ;;  %v3861_v47 = vadd.f32 %v3860_v44, %v3859_v41  ;;  %v3862_v49 = vpop.f32.mrb[38].mxu0 }
 0x297   : > { %v3973_v48 = vadd.f32 %v3972_v46, %v3971_v42  ;;  %v3974_v50 = vpop.f32.mrb[38].mxu1  ;;  %v3863_v51 = vpop.f32.mrb[39].mxu0 }
 0x298   : > { %v3975_v52 = vpop.f32.mrb[39].mxu1  ;;  %v1639_v53 = vadd.f32 %v3861_v47, %v4832_v10  ;;  %v3864_v55 = vadd.f32 %v3863_v51, %v3862_v49 }
 0x299   : > { %v3976_v57 = vadd.f32 %v3975_v52, %v3974_v50 }
 0x29a   : > { %v4889_v58 = vadd.f32 %v3973_v48, %v1639_v53  ;;  %v1642_v59 = vadd.f32 %v3864_v55, %v4832_v10 }
 0x29c   : > { %v4892_v60 = vadd.f32 %v3976_v57, %v1642_v59  ;;  %v3865_v62 = vpop.f32.mrb[40].mxu0 }
 0x29d   : > { %v3977_v0 = vpop.f32.mrb[40].mxu1  ;;  %v3866_v1 = vpop.f32.mrb[41].mxu0 }
 0x29e   : > { %v3978_v2 = vpop.f32.mrb[41].mxu1  ;;  %v3867_v3 = vadd.f32 %v3866_v1, %v3865_v62  ;;  %v3868_v5 = vpop.f32.mrb[42].mxu0 }
 0x29f   : > { %v3979_v4 = vadd.f32 %v3978_v2, %v3977_v0  ;;  %v3980_v7 = vpop.f32.mrb[42].mxu1  ;;  %v3869_v9 = vpop.f32.mrb[43].mxu0 }
 0x2a0   : > { %v3981_v11 = vpop.f32.mrb[43].mxu1  ;;  %v1647_v12 = vadd.f32 %v3867_v3, %v4832_v10  ;;  %v3870_v13 = vadd.f32 %v3869_v9, %v3868_v5 }
 0x2a1   : > { %v3982_v14 = vadd.f32 %v3981_v11, %v3980_v7 }
 0x2a2   : > { %v4895_v15 = vadd.f32 %v3979_v4, %v1647_v12  ;;  %v1650_v17 = vadd.f32 %v3870_v13, %v4832_v10 }
 0x2a4   : > { %v4898_v19 = vadd.f32 %v3982_v14, %v1650_v17  ;;  %v3871_v20 = vpop.f32.mrb[44].mxu0 }
 0x2a5   : > { %v3983_v21 = vpop.f32.mrb[44].mxu1  ;;  %v3872_v23 = vpop.f32.mrb[45].mxu0 }
 0x2a6   : > { %v3984_v26 = vpop.f32.mrb[45].mxu1  ;;  %v3873_v28 = vadd.f32 %v3872_v23, %v3871_v20  ;;  %v3874_v30 = vpop.f32.mrb[46].mxu0 }
 0x2a7   : > { %v3985_v29 = vadd.f32 %v3984_v26, %v3983_v21  ;;  %v3986_v31 = vpop.f32.mrb[46].mxu1  ;;  %v3875_v32 = vpop.f32.mrb[47].mxu0 }
 0x2a8   : > { %v3987_v33 = vpop.f32.mrb[47].mxu1  ;;  %v1655_v34 = vadd.f32 %v3873_v28, %v4832_v10  ;;  %v3876_v35 = vadd.f32 %v3875_v32, %v3874_v30 }
 0x2a9   : > { %v3988_v37 = vadd.f32 %v3987_v33, %v3986_v31 }
 0x2aa   : > { %v4901_v41 = vadd.f32 %v3985_v29, %v1655_v34  ;;  %v1658_v42 = vadd.f32 %v3876_v35, %v4832_v10 }
 0x2ac   : > { %v4904_v44 = vadd.f32 %v3988_v37, %v1658_v42  ;;  %v3877_v46 = vpop.f32.mrb[48].mxu0 }
 0x2ad   : > { %v3989_v47 = vpop.f32.mrb[48].mxu1  ;;  %v3878_v48 = vpop.f32.mrb[49].mxu0 }
 0x2ae   : > { %v3990_v49 = vpop.f32.mrb[49].mxu1  ;;  %v3879_v50 = vadd.f32 %v3878_v48, %v3877_v46  ;;  %v3880_v52 = vpop.f32.mrb[50].mxu0 }
 0x2af   : > { %v3991_v51 = vadd.f32 %v3990_v49, %v3989_v47  ;;  %v3992_v53 = vpop.f32.mrb[50].mxu1  ;;  %v3881_v55 = vpop.f32.mrb[51].mxu0 }
 0x2b0   : > { %v3993_v57 = vpop.f32.mrb[51].mxu1  ;;  %v1663_v59 = vadd.f32 %v3879_v50, %v4832_v10  ;;  %v3882_v62 = vadd.f32 %v3881_v55, %v3880_v52 }
 0x2b1   : > { %v3994_v0 = vadd.f32 %v3993_v57, %v3992_v53 }
 0x2b2   : > { %v4907_v1 = vadd.f32 %v3991_v51, %v1663_v59  ;;  %v1666_v2 = vadd.f32 %v3882_v62, %v4832_v10 }
 0x2b4   : > { %v4910_v3 = vadd.f32 %v3994_v0, %v1666_v2  ;;  %v3883_v4 = vpop.f32.mrb[52].mxu0 }
 0x2b5   : > { %v3995_v5 = vpop.f32.mrb[52].mxu1  ;;  %v3884_v7 = vpop.f32.mrb[53].mxu0 }
 0x2b6   : > { %v3996_v9 = vpop.f32.mrb[53].mxu1  ;;  %v3885_v11 = vadd.f32 %v3884_v7, %v3883_v4  ;;  %v3886_v13 = vpop.f32.mrb[54].mxu0 }
 0x2b7   : > { %v3997_v12 = vadd.f32 %v3996_v9, %v3995_v5  ;;  %v3998_v14 = vpop.f32.mrb[54].mxu1  ;;  %v3887_v17 = vpop.f32.mrb[55].mxu0 }
 0x2b8   : > { %v3999_v20 = vpop.f32.mrb[55].mxu1  ;;  %v1671_v21 = vadd.f32 %v3885_v11, %v4832_v10  ;;  %v3888_v23 = vadd.f32 %v3887_v17, %v3886_v13 }
 0x2b9   : > { %v4000_v26 = vadd.f32 %v3999_v20, %v3998_v14 }
 0x2ba   : > { %v4913_v28 = vadd.f32 %v3997_v12, %v1671_v21  ;;  %v1674_v29 = vadd.f32 %v3888_v23, %v4832_v10  ;;  %v1858_v23 = vmax.f32 (!%p3251_p11), %v4835_v22, 0.0 }
 0x2bc   : > { %v4916_v30 = vadd.f32 %v4000_v26, %v1674_v29  ;;  %v3889_v31 = vpop.f32.mrb[56].mxu0  ;;  %v1859_v26 = vmax.f32 (!%p3251_p11), %v4838_v24, 0.0  ;;  %v1860_v29 = vmax.f32 (!%p3251_p11), %v4841_v38, 0.0 }
 0x2bd   : > { %v4001_v32 = vpop.f32.mrb[56].mxu1  ;;  %v3890_v33 = vpop.f32.mrb[57].mxu0 }
 0x2be   : > { %v4002_v34 = vpop.f32.mrb[57].mxu1  ;;  %v3891_v35 = vadd.f32 %v3890_v33, %v3889_v31  ;;  %v3892_v42 = vpop.f32.mrb[58].mxu0  ;;  %v1861_v31 = vmax.f32 (!%p3251_p11), %v4844_v40, 0.0  ;;  %v1864_v33 = vmax.f32 (!%p3251_p11), %v4853_v6, 0.0 }
 0x2bf   : > { %v4003_v37 = vadd.f32 %v4002_v34, %v4001_v32  ;;  %v4004_v46 = vpop.f32.mrb[58].mxu1  ;;  %v3893_v47 = vpop.f32.mrb[59].mxu0  ;;  %v1862_v32 = vmax.f32 (!%p3251_p11), %v4847_v54, 0.0  ;;  %v1865_v34 = vmax.f32 (!%p3251_p11), %v4856_v8, 0.0 }
 0x2c0   : > { %v4005_v48 = vpop.f32.mrb[59].mxu1  ;;  %v1679_v49 = vadd.f32 %v3891_v35, %v4832_v10  ;;  %v3894_v50 = vadd.f32 %v3893_v47, %v3892_v42  ;;  %v1890_v35 = vpack.c.bf16 (!%p3251_p11), %v1859_v26, %v1858_v23  ;;  %v1866_v42 = vmax.f32 (!%p3251_p11), %v4859_v25, 0.0 }
 0x2c1   : > { %v4006_v51 = vadd.f32 %v4005_v48, %v4004_v46  ;;  %v1867_v46 = vmax.f32 (!%p3251_p11), %v4862_v27, 0.0  ;;  %v1893_v48 = vpack.c.bf16 (!%p3251_p11), %v1865_v34, %v1864_v33  ;;  %v1881_v26 = vmax.f32 (!%p3251_p11), %v4904_v44, 0.0 }
 0x2c2   : > { %v4919_v52 = vadd.f32 %v4003_v37, %v1679_v49  ;;  %v1682_v53 = vadd.f32 %v3894_v50, %v4832_v10  ;;  %v1891_v37 = vpack.c.bf16 (!%p3251_p11), %v1861_v31, %v1860_v29  ;;  %v1868_v49 = vmax.f32 (!%p3251_p11), %v4865_v43, 0.0  ;;  %1910 = vst [vmem:[%s4944_s29] sm:$0xff] (!%p3251_p11), %v1890_v35 }
 0x2c3   : > { %v1869_v50 = vmax.f32 (!%p3251_p11), %v4868_v45, 0.0  ;;  %1913 = vst [vmem:[%s4944_s29 + $0x18] sm:$0xff] (!%p3251_p11), %v1893_v48  ;;  %v1882_v29 = vmax.f32 (!%p3251_p11), %v4907_v1, 0.0  ;;  %v1883_v31 = vmax.f32 (!%p3251_p11), %v4910_v3, 0.0  ;;  %v1885_v33 = vmax.f32 (!%p3251_p11), %v4916_v30, 0.0 }
 0x2c4   : > { %v4922_v55 = vadd.f32 %v4006_v51, %v1682_v53  ;;  %v3895_v57 = vpop.f32.mrb[60].mxu0  ;;  %1911 = vst [vmem:[%s4944_s29 + $0x8] sm:$0xff] (!%p3251_p11), %v1891_v37  ;;  %v1894_v51 = vpack.c.bf16 (!%p3251_p11), %v1867_v46, %v1866_v42  ;;  %v1870_v53 = vmax.f32 (!%p3251_p11), %v4871_v61, 0.0  ;;  %v1886_v34 = vmax.f32 (!%p3251_p11), %v4919_v52, 0.0 }
 0x2c5   : > { %v4007_v59 = vpop.f32.mrb[60].mxu1  ;;  %v3896_v62 = vpop.f32.mrb[61].mxu0  ;;  %v1902_v37 = vpack.c.bf16 (!%p3251_p11), %v1883_v31, %v1882_v29 }
 0x2c6   : > { %v4008_v0 = vpop.f32.mrb[61].mxu1  ;;  %v3897_v2 = vadd.f32 %v3896_v62, %v3895_v57  ;;  %v3898_v5 = vpop.f32.mrb[62].mxu0  ;;  %1857 = sbr.rel (%p3251_p11) target bundleno = 723 (0x2d3), region = 56  ;;  %v1871_v57 = vmax.f32 (!%p3251_p11), %v4874_v63, 0.0  ;;  %v1895_v62 = vpack.c.bf16 (!%p3251_p11), %v1869_v50, %v1868_v49  ;;  %1914 = vst [vmem:[%s4944_s29 + $0x20] sm:$0xff] (!%p3251_p11), %v1894_v51  ;;  %v1887_v42 = vmax.f32 (!%p3251_p11), %v4922_v55, 0.0 }
 0x2c7   : > { %v4009_v4 = vadd.f32 %v4008_v0, %v4007_v59  ;;  %v4010_v7 = vpop.f32.mrb[62].mxu1  ;;  %v3899_v9 = vpop.f32.mrb[63].mxu0  ;;  %v1872_v59 = vmax.f32 (!%p3251_p11), %v4877_v16, 0.0  ;;  %v1873_v0 = vmax.f32 (!%p3251_p11), %v4880_v18, 0.0  ;;  %1922 = vst [vmem:[%s4944_s29 + $0x60] sm:$0xff] (!%p3251_p11), %v1902_v37 }
 0x2c8   : > { %v4011_v11 = vpop.f32.mrb[63].mxu1  ;;  %v1687_v12 = vadd.f32 %v3897_v2, %v4832_v10  ;;  %v3900_v13 = vadd.f32 %v3899_v9, %v3898_v5  ;;  %v1874_v2 = vmax.f32 (!%p3251_p11), %v4883_v36, 0.0  ;;  %v1896_v5 = vpack.c.bf16 (!%p3251_p11), %v1871_v57, %v1870_v53  ;;  %1915 = vst [vmem:[%s4944_s29 + $0x28] sm:$0xff] (!%p3251_p11), %v1895_v62 }
 0x2c9   : > { %v4012_v14 = vadd.f32 %v4011_v11, %v4010_v7  ;;  %v1876_v7 = vmax.f32 (!%p3251_p11), %v4889_v58, 0.0  ;;  %v1877_v9 = vmax.f32 (!%p3251_p11), %v4892_v60, 0.0  ;;  %v1878_v11 = vmax.f32 (!%p3251_p11), %v4895_v15, 0.0 }
 0x2ca   : > { %v4925_v17 = vadd.f32 %v4009_v4, %v1687_v12  ;;  %v1690_v20 = vadd.f32 %v3900_v13, %v4832_v10  ;;  %v1863_v10 = vmax.f32 (!%p3251_p11), %v4850_v56, 0.0  ;;  %v1875_v4 = vmax.f32 (!%p3251_p11), %v4886_v39, 0.0  ;;  %1916 = vst [vmem:[%s4944_s29 + $0x30] sm:$0xff] (!%p3251_p11), %v1896_v5 }
 0x2cb   : > { %v1897_v12 = vpack.c.bf16 (!%p3251_p11), %v1873_v0, %v1872_v59  ;;  %v1899_v23 = vpack.c.bf16 (!%p3251_p11), %v1877_v9, %v1876_v7  ;;  %v1904_v49 = vpack.c.bf16 (!%p3251_p11), %v1887_v42, %v1886_v34 }
 0x2cc   : > { %v4928_v21 = vadd.f32 %v4012_v14, %v1690_v20  ;;  %v1892_v47 = vpack.c.bf16 (!%p3251_p11), %v1863_v10, %v1862_v32  ;;  %v1898_v13 = vpack.c.bf16 (!%p3251_p11), %v1875_v4, %v1874_v2  ;;  %v1879_v14 = vmax.f32 (!%p3251_p11), %v4898_v19, 0.0 }
 0x2cd   : > { %v1880_v20 = vmax.f32 %v4901_v41, 0.0  ;;  %1917 = vst [vmem:[%s4944_s29 + $0x38] sm:$0xff] %v1897_v12  ;;  %v1884_v10 = vmax.f32 %v4913_v28, 0.0  ;;  %1919 = vst [vmem:[%s4944_s29 + $0x48] sm:$0xff] %v1899_v23  ;;  %v1888_v46 = vmax.f32 %v4925_v17, 0.0 }
 0x2ce   : > { %1912 = vst [vmem:[%s4944_s29 + $0x10] sm:$0xff] %v1892_v47  ;;  %1918 = vst [vmem:[%s4944_s29 + $0x40] sm:$0xff] %v1898_v13  ;;  %v1900_v32 = vpack.c.bf16 %v1879_v14, %v1878_v11  ;;  %v1889_v48 = vmax.f32 %v4928_v21, 0.0 }
 0x2cf   : > { %v1901_v35 = vpack.c.bf16 %v1881_v26, %v1880_v20  ;;  %v1903_v47 = vpack.c.bf16 %v1885_v33, %v1884_v10  ;;  %1924 = vst [vmem:[%s4944_s29 + $0x70] sm:$0xff] %v1904_v49 }
 0x2d0   : > { %1920 = vst [vmem:[%s4944_s29 + $0x50] sm:$0xff] %v1900_v32  ;;  %v1905_v50 = vpack.c.bf16 %v1889_v48, %v1888_v46 }
 0x2d1   : > { %1921 = vst [vmem:[%s4944_s29 + $0x58] sm:$0xff] %v1901_v35  ;;  %1923 = vst [vmem:[%s4944_s29 + $0x68] sm:$0xff] %v1903_v47 }
 0x2d2   : > { %1925 = vst [vmem:[%s4944_s29 + $0x78] sm:$0xff] %v1905_v50 }
 0x2d3 PF: > { %p3253_p12 = scmp.ne.s32.totalorder %s4535_s10, 0 }
 0x2d4   : > { %s2057_s27 = sshra.s32 (!%p3253_p12), %s4636_s17, 3  ;;  %v3467_v51 = vpack.c.bf16 (!%p3253_p12), %v4838_v24, %v4835_v22  ;;  %v3472_v53 = vpack.c.bf16 (!%p3253_p12), %v4844_v40, %v4841_v38  ;;  %v3477_v57 = vpack.c.bf16 (!%p3253_p12), %v4850_v56, %v4847_v54  ;;  %v3482_v59 = vpack.c.bf16 (!%p3253_p12), %v4856_v8, %v4853_v6 }
 0x2d5   : > { %1928 = sbr.rel (%p3253_p12) target bundleno = 735 (0x2df), region = 60  ;;  %s3286_s14 = sshll.u32 (!%p3253_p12), %s2057_s27, 2  ;;  %v3487_v62 = vpack.c.bf16 (!%p3253_p12), %v4862_v27, %v4859_v25  ;;  %v3492_v0 = vpack.c.bf16 (!%p3253_p12), %v4868_v45, %v4865_v43  ;;  %v3497_v2 = vpack.c.bf16 (!%p3253_p12), %v4874_v63, %v4871_v61  ;;  %v3502_v4 = vpack.c.bf16 (!%p3253_p12), %v4880_v18, %v4877_v16 }
 0x2d6   : > { %s2060_s20 = scalar_lea.vmem (!%p3253_p12), %s5614_s9, %s3286_s14  ;;  %v3507_v5 = vpack.c.bf16 (!%p3253_p12), %v4886_v39, %v4883_v36  ;;  %v3512_v7 = vpack.c.bf16 (!%p3253_p12), %v4892_v60, %v4889_v58  ;;  %v3517_v9 = vpack.c.bf16 (!%p3253_p12), %v4898_v19, %v4895_v15  ;;  %v3522_v11 = vpack.c.bf16 (!%p3253_p12), %v4904_v44, %v4901_v41 }
 0x2d7   : > { %3468 = vst [vmem:[%s2060_s20] sm:$0xff] (!%p3253_p12), %v3467_v51   ;;  %3704 = vst [vmem:[%s2060_s20 + $0x8] sm:$0xff] (!%p3253_p12), %v3472_v53   ;;  %v3527_v12 = vpack.c.bf16 (!%p3253_p12), %v4910_v3, %v4907_v1  ;;  %v3532_v13 = vpack.c.bf16 (!%p3253_p12), %v4916_v30, %v4913_v28  ;;  %v3537_v14 = vpack.c.bf16 (!%p3253_p12), %v4922_v55, %v4919_v52 }
 0x2d8   : > { %3705 = vst [vmem:[%s2060_s20 + $0x10] sm:$0xff] (!%p3253_p12), %v3477_v57   ;;  %3706 = vst [vmem:[%s2060_s20 + $0x18] sm:$0xff] (!%p3253_p12), %v3482_v59   ;;  %v3542_v20 = vpack.c.bf16 (!%p3253_p12), %v4928_v21, %v4925_v17 }
 0x2d9   : > { %3707 = vst [vmem:[%s2060_s20 + $0x20] sm:$0xff] (!%p3253_p12), %v3487_v62   ;;  %3708 = vst [vmem:[%s2060_s20 + $0x28] sm:$0xff] (!%p3253_p12), %v3492_v0  }
 0x2da   : > { %3709 = vst [vmem:[%s2060_s20 + $0x30] sm:$0xff] (!%p3253_p12), %v3497_v2   ;;  %3710 = vst [vmem:[%s2060_s20 + $0x38] sm:$0xff] (!%p3253_p12), %v3502_v4  }
 0x2db   : > { %3711 = vst [vmem:[%s2060_s20 + $0x40] sm:$0xff] (!%p3253_p12), %v3507_v5   ;;  %3712 = vst [vmem:[%s2060_s20 + $0x48] sm:$0xff] (!%p3253_p12), %v3512_v7  }
 0x2dc   : > { %3713 = vst [vmem:[%s2060_s20 + $0x50] sm:$0xff] %v3517_v9   ;;  %3714 = vst [vmem:[%s2060_s20 + $0x58] sm:$0xff] %v3522_v11  }
 0x2dd   : > { %3715 = vst [vmem:[%s2060_s20 + $0x60] sm:$0xff] %v3527_v12   ;;  %3716 = vst [vmem:[%s2060_s20 + $0x68] sm:$0xff] %v3532_v13  }
 0x2de   : > { %3717 = vst [vmem:[%s2060_s20 + $0x70] sm:$0xff] %v3537_v14   ;;  %3718 = vst [vmem:[%s2060_s20 + $0x78] sm:$0xff] %v3542_v20  }
 0x2df PF: > { %p3287_p13 = scmp.ne.s32.totalorder %s4535_s10, 1 }
 0x2e0   : > { %v4373_v23 = vld [vmem:[%s5609_s4] sm:$0xff] (!%p3287_p13)   ;;  %v2097_v26 = vpack.c.bf16 (!%p3287_p13), %v4838_v24, %v4835_v22  ;;  %s2225_s21 = sshra.s32 (!%p3287_p13), %s4636_s17, 3  ;;  %v2105_v29 = vpack.c.bf16 (!%p3287_p13), %v4886_v39, %v4883_v36  ;;  %v5030_v31 = vpack.c.bf16 (!%p3287_p13), %v4844_v40, %v4841_v38  ;;  %v5034_v32 = vpack.c.bf16 (!%p3287_p13), %v4892_v60, %v4889_v58  ;;  %v4374_v10 = vld [vmem:[%s5609_s4 + $0x8] sm:$0xff] (!%p3287_p13)   ;;  %v4375_v51 = vld [vmem:[%s5609_s4 + $0x10] sm:$0xff] (!%p3287_p13)  }
 0x2e1   : > { %2096 = sbr.rel (%p3287_p13) target bundleno = 1014 (0x3f6), region = 64  ;;  %s5039_s25 = sshll.u32 (!%p3287_p13), %s2225_s21, 2  ;;  %v5043_v33 = vpack.c.bf16 (!%p3287_p13), %v4850_v56, %v4847_v54  ;;  %v5047_v34 = vpack.c.bf16 (!%p3287_p13), %v4898_v19, %v4895_v15  ;;  %v5051_v35 = vpack.c.bf16 (!%p3287_p13), %v4856_v8, %v4853_v6  ;;  %v5055_v37 = vpack.c.bf16 (!%p3287_p13), %v4904_v44, %v4901_v41  ;;  %4117 = vmatprep.subr.bf16.mxu0 (!%p3287_p13), %v4373_v23  ;;  %v4376_v59 = vld [vmem:[%s5609_s4 + $0x18] sm:$0xff] (!%p3287_p13)   ;;  %v4377_v62 = vld [vmem:[%s5609_s4 + $0x20] sm:$0xff] (!%p3287_p13)   ;;  %v4378_v0 = vld [vmem:[%s5609_s4 + $0x28] sm:$0xff] (!%p3287_p13)  }
 0x2e2   : > { %4181 = vmatprep.subr.bf16.mxu1 (!%p3287_p13), %v4373_v23  ;;  %s5061_s18 = scalar_lea.vmem (!%p3287_p13), %s5613_s8, %s5039_s25  ;;  %v5065_v42 = vpack.c.bf16 (!%p3287_p13), %v4862_v27, %v4859_v25  ;;  %v5069_v46 = vpack.c.bf16 (!%p3287_p13), %v4910_v3, %v4907_v1  ;;  %v5073_v47 = vpack.c.bf16 (!%p3287_p13), %v4868_v45, %v4865_v43  ;;  %4118 = vmatpush3.bf16.msra.mxu0 (!%p3287_p13), %v4373_v23  ;;  %v4379_v2 = vld [vmem:[%s5609_s4 + $0x30] sm:$0xff] (!%p3287_p13)   ;;  %v4380_v4 = vld [vmem:[%s5609_s4 + $0x38] sm:$0xff] (!%p3287_p13)   ;;  %v5140_v7 = vld [vmem:[%s5610_s5] ss:$0 sm:$0xff] (!%p3287_p13)  ;;  %s5152_s29 = scalar_lea.vmem (!%p3287_p13), %s5612_s7, %s5039_s25 }
 0x2e3   : > { %4189 = vmatpush3.bf16.msra.mxu1 (!%p3287_p13), %v4373_v23  ;;  %3548 = vst [vmem:[%s5061_s18] sm:$0xff] (!%p3287_p13), %v2097_v26   ;;  %3726 = vst [vmem:[%s5061_s18 + $0x40] sm:$0xff] (!%p3287_p13), %v2105_v29   ;;  %v2110_v48 = vpack.c.bf16 (!%p3287_p13), %v4916_v30, %v4913_v28  ;;  %v2103_v49 = vpack.c.bf16 (!%p3287_p13), %v4874_v63, %v4871_v61  ;;  %v2111_v50 = vpack.c.bf16 (!%p3287_p13), %v4922_v55, %v4919_v52 }
 0x2e4   : > { %3719 = vst [vmem:[%s5061_s18 + $0x8] sm:$0xff] (!%p3287_p13), %v5030_v31   ;;  %3727 = vst [vmem:[%s5061_s18 + $0x48] sm:$0xff] (!%p3287_p13), %v5034_v32   ;;  %4119 = vmatprep.subr.bf16.mxu0 (!%p3287_p13), %v4374_v10  ;;  %4182 = vmatprep.subr.bf16.mxu1 (!%p3287_p13), %v4374_v10  ;;  %v2104_v53 = vpack.c.bf16 (!%p3287_p13), %v4880_v18, %v4877_v16  ;;  %v2112_v57 = vpack.c.bf16 (!%p3287_p13), %v4928_v21, %v4925_v17 }
 0x2e5   : > { %3720 = vst [vmem:[%s5061_s18 + $0x10] sm:$0xff] (!%p3287_p13), %v5043_v33   ;;  %3728 = vst [vmem:[%s5061_s18 + $0x50] sm:$0xff] (!%p3287_p13), %v5047_v34   ;;  %4133 = vmatprep.mubr.bf16.mxu0 (!%p3287_p13), %v2097_v26  ;;  %4149 = vmatprep.mubr.bf16.mxu1 (!%p3287_p13), %v2105_v29 }
 0x2e6   : > { %3721 = vst [vmem:[%s5061_s18 + $0x18] sm:$0xff] (!%p3287_p13), %v5051_v35   ;;  %3729 = vst [vmem:[%s5061_s18 + $0x58] sm:$0xff] (!%p3287_p13), %v5055_v37   ;;  %4120 = vmatpush3.bf16.msra.mxu0 (!%p3287_p13), %v4374_v10 }
 0x2e7   : > { %3722 = vst [vmem:[%s5061_s18 + $0x20] sm:$0xff] (!%p3287_p13), %v5065_v42   ;;  %3730 = vst [vmem:[%s5061_s18 + $0x60] sm:$0xff] (!%p3287_p13), %v5069_v46   ;;  %4190 = vmatpush3.bf16.msra.mxu1 (!%p3287_p13), %v4374_v10  ;;  %4121 = vmatprep.subr.bf16.mxu0 (!%p3287_p13), %v4375_v51 }
 0x2e8   : > { %3723 = vst [vmem:[%s5061_s18 + $0x28] sm:$0xff] %v5073_v47   ;;  %3731 = vst [vmem:[%s5061_s18 + $0x68] sm:$0xff] %v2110_v48   ;;  %4183 = vmatprep.subr.bf16.mxu1 %v4375_v51 }
 0x2e9   : > { %3724 = vst [vmem:[%s5061_s18 + $0x30] sm:$0xff] %v2103_v49   ;;  %3732 = vst [vmem:[%s5061_s18 + $0x70] sm:$0xff] %v2111_v50  }
 0x2ea   : > { %3725 = vst [vmem:[%s5061_s18 + $0x38] sm:$0xff] %v2104_v53   ;;  %3733 = vst [vmem:[%s5061_s18 + $0x78] sm:$0xff] %v2112_v57   ;;  %4122 = vmatpush3.bf16.msra.mxu0 %v4375_v51 }
 0x2eb   : > { %4191 = vmatpush3.bf16.msra.mxu1 %v4375_v51  ;;  %4123 = vmatprep.subr.bf16.mxu0 %v4376_v59 }
 0x2ec   : > { %4184 = vmatprep.subr.bf16.mxu1 %v4376_v59 }
 0x2ee   : > { %4124 = vmatpush3.bf16.msra.mxu0 %v4376_v59 }
 0x2ef   : > { %4192 = vmatpush3.bf16.msra.mxu1 %v4376_v59  ;;  %4125 = vmatprep.subr.bf16.mxu0 %v4377_v62 }
 0x2f0   : > { %4185 = vmatprep.subr.bf16.mxu1 %v4377_v62 }
 0x2f2   : > { %4126 = vmatpush3.bf16.msra.mxu0 %v4377_v62 }
 0x2f3   : > { %4193 = vmatpush3.bf16.msra.mxu1 %v4377_v62  ;;  %4127 = vmatprep.subr.bf16.mxu0 %v4378_v0 }
 0x2f4   : > { %4186 = vmatprep.subr.bf16.mxu1 %v4378_v0 }
 0x2f6   : > { %4128 = vmatpush3.bf16.msra.mxu0 %v4378_v0 }
 0x2f7   : > { %4194 = vmatpush3.bf16.msra.mxu1 %v4378_v0  ;;  %4129 = vmatprep.subr.bf16.mxu0 %v4379_v2 }
 0x2f8   : > { %4187 = vmatprep.subr.bf16.mxu1 %v4379_v2 }
 0x2fa   : > { %4130 = vmatpush3.bf16.msra.mxu0 %v4379_v2 }
 0x2fb   : > { %4195 = vmatpush3.bf16.msra.mxu1 %v4379_v2  ;;  %4131 = vmatprep.subr.bf16.mxu0 %v4380_v4 }
 0x2fc   : > { %4188 = vmatprep.subr.bf16.mxu1 %v4380_v4 }
 0x2fe   : > { %4132 = vmatpush3.bf16.msra.mxu0 %v4380_v4 }
 0x2ff   : > { %4196 = vmatpush3.bf16.msra.mxu1 %v4380_v4 }
 0x301   : > { %4134 = vmatmul.mubr.bf16.vlgmr.msra.gmra.mrb[0].mxu0 %v5030_v31 }
 0x302   : > { %4150 = vmatmul.mubr.bf16.vlgmr.msra.gmra.mrb[0].mxu1 %v5034_v32  ;;  %4137 = vmatprep.mubr.bf16.mxu0 %v5043_v33 }
 0x303   : > { %4153 = vmatprep.mubr.bf16.mxu1 %v5047_v34 }
 0x309   : > { %4138 = vmatmul.mubr.bf16.gmra.mrb[4].mxu0 %v5051_v35 }
 0x30a   : > { %4154 = vmatmul.mubr.bf16.gmra.mrb[4].mxu1 %v5055_v37  ;;  %4141 = vmatprep.mubr.bf16.mxu0 %v5065_v42 }
 0x30b   : > { %4157 = vmatprep.mubr.bf16.mxu1 %v5069_v46 }
 0x311   : > { %4142 = vmatmul.mubr.bf16.gmra.mrb[8].mxu0 %v5073_v47 }
 0x312   : > { %4158 = vmatmul.mubr.bf16.gmra.mrb[8].mxu1 %v2110_v48  ;;  %4145 = vmatprep.mubr.bf16.mxu0 %v2103_v49 }
 0x313   : > { %4161 = vmatprep.mubr.bf16.mxu1 %v2111_v50 }
 0x319   : > { %4146 = vmatmul.mubr.bf16.gmra.mrb[12].mxu0 %v2104_v53 }
 0x31a   : > { %4162 = vmatmul.mubr.bf16.gmra.mrb[12].mxu1 %v2112_v57 }
 0x3d4   : > { %v4135_v5 = vpop.f32.mrb[0].mxu0 }
 0x3d5   : > { %v4151_v9 = vpop.f32.mrb[0].mxu1  ;;  %v2366_v11 = vpop.f32.mrb[1].mxu0  ;;  %v2375_v20 = vadd.f32 %v4135_v5, %v5140_v7 }
 0x3d6   : > { %v2430_v12 = vpop.f32.mrb[1].mxu1  ;;  %v4136_v13 = vpop.f32.mrb[2].mxu0  ;;  %v2439_v23 = vadd.f32 %v4151_v9, %v5140_v7  ;;  %v2367_v10 = vadd.f32 %v5140_v7, %v2366_v11 }
 0x3d7   : > { %v4152_v14 = vpop.f32.mrb[2].mxu1  ;;  %v2378_v26 = vadd.f32 %v4136_v13, %v5140_v7  ;;  %v2369_v31 = vpop.f32.mrb[3].mxu0  ;;  %v2431_v33 = vadd.f32 %v5140_v7, %v2430_v12 }
 0x3d8   : > { %v2442_v29 = vadd.f32 %v4152_v14, %v5140_v7  ;;  %v2433_v32 = vpop.f32.mrb[3].mxu1  ;;  %v2370_v34 = vadd.f32 %v5140_v7, %v2369_v31 }
 0x3d9   : > { %v2434_v35 = vadd.f32 %v5140_v7, %v2433_v32  ;;  %v3632_v37 = vpack.c.bf16 %v2378_v26, %v2375_v20 }
 0x3da   : > { %v3672_v42 = vpack.c.bf16 %v2442_v29, %v2439_v23  ;;  %v3627_v46 = vpack.c.bf16 %v2370_v34, %v2367_v10 }
 0x3db   : > { %v3667_v47 = vpack.c.bf16 %v2434_v35, %v2431_v33  ;;  %3734 = vst [vmem:[%s5152_s29 + $0x8] sm:$0xff] %v3632_v37  }
 0x3dc   : > { %3742 = vst [vmem:[%s5152_s29 + $0x48] sm:$0xff] %v3672_v42   ;;  %3628 = vst [vmem:[%s5152_s29] sm:$0xff] %v3627_v46   ;;  %v4139_v48 = vpop.f32.mrb[4].mxu0 }
 0x3dd   : > { %3741 = vst [vmem:[%s5152_s29 + $0x40] sm:$0xff] %v3667_v47   ;;  %v4155_v49 = vpop.f32.mrb[4].mxu1  ;;  %v2382_v50 = vpop.f32.mrb[5].mxu0  ;;  %v2391_v59 = vadd.f32 %v4139_v48, %v5140_v7 }
 0x3de   : > { %v2446_v51 = vpop.f32.mrb[5].mxu1  ;;  %v4140_v53 = vpop.f32.mrb[6].mxu0  ;;  %v2455_v62 = vadd.f32 %v4155_v49, %v5140_v7  ;;  %v2383_v9 = vadd.f32 %v5140_v7, %v2382_v50 }
 0x3df   : > { %v4156_v57 = vpop.f32.mrb[6].mxu1  ;;  %v2394_v0 = vadd.f32 %v4140_v53, %v5140_v7  ;;  %v2385_v4 = vpop.f32.mrb[7].mxu0  ;;  %v2447_v11 = vadd.f32 %v5140_v7, %v2446_v51 }
 0x3e0   : > { %v2458_v2 = vadd.f32 %v4156_v57, %v5140_v7  ;;  %v2449_v5 = vpop.f32.mrb[7].mxu1  ;;  %v2386_v12 = vadd.f32 %v5140_v7, %v2385_v4 }
 0x3e1   : > { %v2450_v13 = vadd.f32 %v5140_v7, %v2449_v5  ;;  %v3642_v14 = vpack.c.bf16 %v2394_v0, %v2391_v59 }
 0x3e2   : > { %v3682_v20 = vpack.c.bf16 %v2458_v2, %v2455_v62  ;;  %v3637_v23 = vpack.c.bf16 %v2386_v12, %v2383_v9 }
 0x3e3   : > { %v3677_v26 = vpack.c.bf16 %v2450_v13, %v2447_v11  ;;  %3736 = vst [vmem:[%s5152_s29 + $0x18] sm:$0xff] %v3642_v14  }
 0x3e4   : > { %3744 = vst [vmem:[%s5152_s29 + $0x58] sm:$0xff] %v3682_v20   ;;  %3735 = vst [vmem:[%s5152_s29 + $0x10] sm:$0xff] %v3637_v23   ;;  %v4143_v29 = vpop.f32.mrb[8].mxu0 }
 0x3e5   : > { %3743 = vst [vmem:[%s5152_s29 + $0x50] sm:$0xff] %v3677_v26   ;;  %v4159_v31 = vpop.f32.mrb[8].mxu1  ;;  %v2398_v32 = vpop.f32.mrb[9].mxu0  ;;  %v2407_v35 = vadd.f32 %v4143_v29, %v5140_v7 }
 0x3e6   : > { %v2462_v10 = vpop.f32.mrb[9].mxu1  ;;  %v4144_v33 = vpop.f32.mrb[10].mxu0  ;;  %v2471_v37 = vadd.f32 %v4159_v31, %v5140_v7  ;;  %v2399_v49 = vadd.f32 %v5140_v7, %v2398_v32 }
 0x3e7   : > { %v4160_v34 = vpop.f32.mrb[10].mxu1  ;;  %v2410_v42 = vadd.f32 %v4144_v33, %v5140_v7  ;;  %v2401_v47 = vpop.f32.mrb[11].mxu0  ;;  %v2463_v50 = vadd.f32 %v5140_v7, %v2462_v10 }
 0x3e8   : > { %v2474_v46 = vadd.f32 %v4160_v34, %v5140_v7  ;;  %v2465_v48 = vpop.f32.mrb[11].mxu1  ;;  %v2402_v51 = vadd.f32 %v5140_v7, %v2401_v47 }
 0x3e9   : > { %v2466_v53 = vadd.f32 %v5140_v7, %v2465_v48  ;;  %v3652_v57 = vpack.c.bf16 %v2410_v42, %v2407_v35 }
 0x3ea   : > { %v3692_v59 = vpack.c.bf16 %v2474_v46, %v2471_v37  ;;  %v3647_v62 = vpack.c.bf16 %v2402_v51, %v2399_v49 }
 0x3eb   : > { %v3687_v0 = vpack.c.bf16 %v2466_v53, %v2463_v50  ;;  %3738 = vst [vmem:[%s5152_s29 + $0x28] sm:$0xff] %v3652_v57  }
 0x3ec   : > { %3746 = vst [vmem:[%s5152_s29 + $0x68] sm:$0xff] %v3692_v59   ;;  %3737 = vst [vmem:[%s5152_s29 + $0x20] sm:$0xff] %v3647_v62   ;;  %v4147_v2 = vpop.f32.mrb[12].mxu0 }
 0x3ed   : > { %3745 = vst [vmem:[%s5152_s29 + $0x60] sm:$0xff] %v3687_v0   ;;  %v4163_v4 = vpop.f32.mrb[12].mxu1  ;;  %v2414_v5 = vpop.f32.mrb[13].mxu0  ;;  %v2423_v13 = vadd.f32 %v4147_v2, %v5140_v7 }
 0x3ee   : > { %v2478_v9 = vpop.f32.mrb[13].mxu1  ;;  %v4148_v11 = vpop.f32.mrb[14].mxu0  ;;  %v2487_v14 = vadd.f32 %v4163_v4, %v5140_v7  ;;  %v2415_v31 = vadd.f32 %v5140_v7, %v2414_v5 }
 0x3ef   : > { %v4164_v12 = vpop.f32.mrb[14].mxu1  ;;  %v2426_v20 = vadd.f32 %v4148_v11, %v5140_v7  ;;  %v2417_v26 = vpop.f32.mrb[15].mxu0  ;;  %v2479_v32 = vadd.f32 %v5140_v7, %v2478_v9 }
 0x3f0   : > { %v2490_v23 = vadd.f32 %v4164_v12, %v5140_v7  ;;  %v2481_v29 = vpop.f32.mrb[15].mxu1  ;;  %v2418_v10 = vadd.f32 %v5140_v7, %v2417_v26 }
 0x3f1   : > { %v2482_v33 = vadd.f32 %v5140_v7, %v2481_v29  ;;  %v3662_v34 = vpack.c.bf16 %v2426_v20, %v2423_v13 }
 0x3f2   : > { %v3702_v35 = vpack.c.bf16 %v2490_v23, %v2487_v14  ;;  %v3657_v37 = vpack.c.bf16 %v2418_v10, %v2415_v31 }
 0x3f3   : > { %v3697_v42 = vpack.c.bf16 %v2482_v33, %v2479_v32  ;;  %3740 = vst [vmem:[%s5152_s29 + $0x38] sm:$0xff] %v3662_v34  }
 0x3f4   : > { %3748 = vst [vmem:[%s5152_s29 + $0x78] sm:$0xff] %v3702_v35   ;;  %3739 = vst [vmem:[%s5152_s29 + $0x30] sm:$0xff] %v3657_v37  }
 0x3f5   : > { %3747 = vst [vmem:[%s5152_s29 + $0x70] sm:$0xff] %v3697_v42  }
 0x3f6 PF: > { %p3363_p0 = scmp.ne.s32.totalorder %s4535_s10, 2 }
 0x3f7   : > { %v2659_v46 = vlaneseq (!%p3363_p0)  ;;  %s5524_s27 = scalar_lea.vmem (!%p3363_p0), %s5611_s6, %s4636_s17 }
 0x3f8   : > { %2658 = sbr.rel (%p3363_p0) target bundleno = 1400 (0x578), region = 68 }
 0x3f9   : > { %v5197_v47 = vand.u32 (!%p3363_p0), 127, %v2659_v46 }
 0x3fb   : > { %vm2661_vm0 = vcmp.lt.s32.totalorder (!%p3363_p0), %v5197_v47, 8 }
 0x3fc   : > { %v5203_v7 = vsel (!%p3363_p0), %vm2661_vm0, %v4835_v22, -1e+30  ;;  %v5208_v48 = vsel (!%p3363_p0), %vm2661_vm0, %v4841_v38, -1e+30  ;;  %v5215_v49 = vsel (!%p3363_p0), %vm2661_vm0, %v4838_v24, -1e+30 }
 0x3fd   : > { %2694 = vmax.xlane.f32.xlu0 (!%p3363_p0), %v5203_v7  ;;  %2698 = vmax.xlane.f32.xlu1 (!%p3363_p0), %v5208_v48  ;;  %v5220_v50 = vsel (!%p3363_p0), %vm2661_vm0, %v4844_v40, -1e+30  ;;  %v5227_v22 = vsel (!%p3363_p0), %vm2661_vm0, %v4847_v54, -1e+30  ;;  %v5232_v38 = vsel (!%p3363_p0), %vm2661_vm0, %v4850_v56, -1e+30 }
 0x3fe   : > { %v5239_v24 = vsel (!%p3363_p0), %vm2661_vm0, %v4853_v6, -1e+30  ;;  %v5244_v40 = vsel (!%p3363_p0), %vm2661_vm0, %v4856_v8, -1e+30  ;;  %v5251_v54 = vsel (!%p3363_p0), %vm2661_vm0, %v4859_v25, -1e+30 }
 0x3ff   : > { %v5256_v56 = vsel %vm2661_vm0, %v4862_v27, -1e+30  ;;  %v5263_v6 = vsel %vm2661_vm0, %v4865_v43, -1e+30  ;;  %v5268_v8 = vsel %vm2661_vm0, %v4868_v45, -1e+30 }
 0x400   : > { %v5275_v25 = vsel %vm2661_vm0, %v4871_v61, -1e+30  ;;  %v5280_v27 = vsel %vm2661_vm0, %v4874_v63, -1e+30  ;;  %v5287_v43 = vsel %vm2661_vm0, %v4877_v16, -1e+30 }
 0x401   : > { %2696 = vmax.xlane.f32.xlu0 %v5215_v49  ;;  %2700 = vmax.xlane.f32.xlu1 %v5220_v50  ;;  %v5292_v45 = vsel %vm2661_vm0, %v4880_v18, -1e+30  ;;  %v5299_v61 = vsel %vm2661_vm0, %v4883_v36, -1e+30  ;;  %v5304_v63 = vsel %vm2661_vm0, %v4886_v39, -1e+30 }
 0x402   : > { %v5311_v16 = vsel %vm2661_vm0, %v4889_v58, -1e+30  ;;  %v5316_v18 = vsel %vm2661_vm0, %v4892_v60, -1e+30  ;;  %v5323_v36 = vsel %vm2661_vm0, %v4895_v15, -1e+30 }
 0x403   : > { %v5328_v39 = vsel %vm2661_vm0, %v4898_v19, -1e+30  ;;  %v5335_v58 = vsel %vm2661_vm0, %v4901_v41, -1e+30  ;;  %v5340_v60 = vsel %vm2661_vm0, %v4904_v44, -1e+30 }
 0x404   : > { %v5347_v15 = vsel %vm2661_vm0, %v4907_v1, -1e+30  ;;  %v5352_v19 = vsel %vm2661_vm0, %v4910_v3, -1e+30  ;;  %v5359_v41 = vsel %vm2661_vm0, %v4913_v28, -1e+30 }
 0x405   : > { %2702 = vmax.xlane.f32.xlu0 %v5227_v22  ;;  %2704 = vmax.xlane.f32.xlu1 %v5232_v38  ;;  %v5364_v44 = vsel %vm2661_vm0, %v4916_v30, -1e+30  ;;  %v5371_v1 = vsel %vm2661_vm0, %v4919_v52, -1e+30  ;;  %v5376_v3 = vsel %vm2661_vm0, %v4922_v55, -1e+30 }
 0x406   : > { %v5383_v28 = vsel %vm2661_vm0, %v4925_v17, -1e+30  ;;  %v5388_v30 = vsel %vm2661_vm0, %v4928_v21, -1e+30 }
 0x409   : > { %2706 = vmax.xlane.f32.xlu0 %v5239_v24  ;;  %2708 = vmax.xlane.f32.xlu1 %v5244_v40 }
 0x40d   : > { %2710 = vmax.xlane.f32.xlu0 %v5251_v54  ;;  %2712 = vmax.xlane.f32.xlu1 %v5256_v56 }
 0x411   : > { %2714 = vmax.xlane.f32.xlu0 %v5263_v6  ;;  %2716 = vmax.xlane.f32.xlu1 %v5268_v8 }
 0x415   : > { %2718 = vmax.xlane.f32.xlu0 %v5275_v25  ;;  %2720 = vmax.xlane.f32.xlu1 %v5280_v27 }
 0x419   : > { %2722 = vmax.xlane.f32.xlu0 %v5287_v43  ;;  %2724 = vmax.xlane.f32.xlu1 %v5292_v45 }
 0x41d   : > { %2726 = vmax.xlane.f32.xlu0 %v5299_v61  ;;  %2728 = vmax.xlane.f32.xlu1 %v5304_v63 }
 0x421   : > { %2730 = vmax.xlane.f32.xlu0 %v5311_v16  ;;  %2732 = vmax.xlane.f32.xlu1 %v5316_v18 }
 0x425   : > { %2734 = vmax.xlane.f32.xlu0 %v5323_v36  ;;  %2736 = vmax.xlane.f32.xlu1 %v5328_v39 }
 0x429   : > { %2738 = vmax.xlane.f32.xlu0 %v5335_v58  ;;  %2740 = vmax.xlane.f32.xlu1 %v5340_v60 }
 0x42d   : > { %2742 = vmax.xlane.f32.xlu0 %v5347_v15  ;;  %2744 = vmax.xlane.f32.xlu1 %v5352_v19 }
 0x431   : > { %2746 = vmax.xlane.f32.xlu0 %v5359_v41  ;;  %2748 = vmax.xlane.f32.xlu1 %v5364_v44 }
 0x435   : > { %2750 = vmax.xlane.f32.xlu0 %v5371_v1  ;;  %2752 = vmax.xlane.f32.xlu1 %v5376_v3 }
 0x439   : > { %2754 = vmax.xlane.f32.xlu0 %v5383_v28  ;;  %2756 = vmax.xlane.f32.xlu1 %v5388_v30 }
 0x48a   : > { %v2695_v52 = vpop.xlane.xlu0 %2694  ;;  %v2699_v55 = vpop.xlane.xlu1 %2698 }
 0x48b   : > { %v5393_v51 = vsub.f32 %v5203_v7, %v2695_v52  ;;  %v5396_v53 = vsub.f32 %v5208_v48, %v2699_v55 }
 0x48d   : > { %v2790_v17 = vmul.f32 1.442695, %v5393_v51  ;;  %v2794_v57 = vmul.f32 1.442695, %v5396_v53 }
 0x48e   : > { %v2697_v59 = vpop.xlane.xlu0 %2696  ;;  %v2701_v62 = vpop.xlane.xlu1 %2700 }
 0x48f   : > { %4381 = vpow2.f32 %v2790_v17  ;;  %v5401_v21 = vsub.f32 %v5215_v49, %v2697_v59  ;;  %v5404_v0 = vsub.f32 %v5220_v50, %v2701_v62 }
 0x490   : > { %4383 = vpow2.f32 %v2794_v57 }
 0x491   : > { %v2792_v2 = vmul.f32 1.442695, %v5401_v21  ;;  %v2796_v4 = vmul.f32 1.442695, %v5404_v0 }
 0x492   : > { %v2703_v5 = vpop.xlane.xlu0 %2702  ;;  %v2705_v9 = vpop.xlane.xlu1 %2704 }
 0x493   : > { %4385 = vpow2.f32 %v2792_v2  ;;  %v5409_v11 = vsub.f32 %v5227_v22, %v2703_v5  ;;  %v5412_v12 = vsub.f32 %v5232_v38, %v2705_v9 }
 0x494   : > { %4387 = vpow2.f32 %v2796_v4 }
 0x495   : > { %v2798_v13 = vmul.f32 1.442695, %v5409_v11  ;;  %v2800_v14 = vmul.f32 1.442695, %v5412_v12 }
 0x496   : > { %v2707_v20 = vpop.xlane.xlu0 %2706  ;;  %v2709_v23 = vpop.xlane.xlu1 %2708 }
 0x497   : > { %4389 = vpow2.f32 %v2798_v13  ;;  %v5417_v26 = vsub.f32 %v5239_v24, %v2707_v20  ;;  %v5420_v29 = vsub.f32 %v5244_v40, %v2709_v23 }
 0x498   : > { %4391 = vpow2.f32 %v2800_v14 }
 0x499   : > { %v4382_v31 = vpop.eup %4381  ;;  %v2802_v32 = vmul.f32 1.442695, %v5417_v26  ;;  %v2804_v10 = vmul.f32 1.442695, %v5420_v29 }
 0x49a   : > { %2854 = vadd.xlane.f32.xlu0 %v4382_v31  ;;  %v2711_v33 = vpop.xlane.xlu0 %2710  ;;  %v2713_v34 = vpop.xlane.xlu1 %2712 }
 0x49b   : > { %v4384_v35 = vpop.eup %4383  ;;  %4393 = vpow2.f32 %v2802_v32  ;;  %v5425_v37 = vsub.f32 %v5251_v54, %v2711_v33  ;;  %v5428_v42 = vsub.f32 %v5256_v56, %v2713_v34 }
 0x49c   : > { %4395 = vpow2.f32 %v2804_v10 }
 0x49d   : > { %v4386_v46 = vpop.eup %4385  ;;  %v2806_v47 = vmul.f32 1.442695, %v5425_v37  ;;  %v2808_v7 = vmul.f32 1.442695, %v5428_v42 }
 0x49e   : > { %2858 = vadd.xlane.f32.xlu0 %v4384_v35  ;;  %2856 = vadd.xlane.f32.xlu1 %v4386_v46  ;;  %v2715_v48 = vpop.xlane.xlu0 %2714  ;;  %v2717_v49 = vpop.xlane.xlu1 %2716 }
 0x49f   : > { %v4388_v50 = vpop.eup %4387  ;;  %4397 = vpow2.f32 %v2806_v47  ;;  %v5433_v22 = vsub.f32 %v5263_v6, %v2715_v48  ;;  %v5436_v38 = vsub.f32 %v5268_v8, %v2717_v49 }
 0x4a0   : > { %4399 = vpow2.f32 %v2808_v7 }
 0x4a1   : > { %v4390_v24 = vpop.eup %4389  ;;  %v2810_v40 = vmul.f32 1.442695, %v5433_v22  ;;  %v2812_v54 = vmul.f32 1.442695, %v5436_v38 }
 0x4a2   : > { %2860 = vadd.xlane.f32.xlu1 %v4388_v50  ;;  %2862 = vadd.xlane.f32.xlu0 %v4390_v24  ;;  %v2719_v56 = vpop.xlane.xlu0 %2718  ;;  %v2721_v52 = vpop.xlane.xlu1 %2720 }
 0x4a3   : > { %v4392_v55 = vpop.eup %4391  ;;  %4401 = vpow2.f32 %v2810_v40  ;;  %v5441_v17 = vsub.f32 %v5275_v25, %v2719_v56  ;;  %v5444_v6 = vsub.f32 %v5280_v27, %v2721_v52 }
 0x4a4   : > { %4403 = vpow2.f32 %v2812_v54 }
 0x4a5   : > { %v4394_v8 = vpop.eup %4393  ;;  %v2814_v57 = vmul.f32 1.442695, %v5441_v17  ;;  %v2816_v59 = vmul.f32 1.442695, %v5444_v6 }
 0x4a6   : > { %2864 = vadd.xlane.f32.xlu1 %v4392_v55  ;;  %2866 = vadd.xlane.f32.xlu0 %v4394_v8  ;;  %v2723_v62 = vpop.xlane.xlu0 %2722  ;;  %v2725_v2 = vpop.xlane.xlu1 %2724 }
 0x4a7   : > { %v4396_v4 = vpop.eup %4395  ;;  %4405 = vpow2.f32 %v2814_v57  ;;  %v5449_v5 = vsub.f32 %v5287_v43, %v2723_v62  ;;  %v5452_v25 = vsub.f32 %v5292_v45, %v2725_v2 }
 0x4a8   : > { %4407 = vpow2.f32 %v2816_v59 }
 0x4a9   : > { %v4398_v27 = vpop.eup %4397  ;;  %v2818_v9 = vmul.f32 1.442695, %v5449_v5  ;;  %v2820_v13 = vmul.f32 1.442695, %v5452_v25 }
 0x4aa   : > { %2868 = vadd.xlane.f32.xlu1 %v4396_v4  ;;  %2870 = vadd.xlane.f32.xlu0 %v4398_v27  ;;  %v2727_v14 = vpop.xlane.xlu0 %2726  ;;  %v2729_v20 = vpop.xlane.xlu1 %2728 }
 0x4ab   : > { %v4400_v23 = vpop.eup %4399  ;;  %4409 = vpow2.f32 %v2818_v9  ;;  %v5457_v31 = vsub.f32 %v5299_v61, %v2727_v14  ;;  %v5460_v43 = vsub.f32 %v5304_v63, %v2729_v20 }
 0x4ac   : > { %4411 = vpow2.f32 %v2820_v13 }
 0x4ad   : > { %v4402_v45 = vpop.eup %4401  ;;  %v2822_v32 = vmul.f32 1.442695, %v5457_v31  ;;  %v2824_v10 = vmul.f32 1.442695, %v5460_v43 }
 0x4ae   : > { %2872 = vadd.xlane.f32.xlu1 %v4400_v23  ;;  %2874 = vadd.xlane.f32.xlu0 %v4402_v45  ;;  %v2731_v33 = vpop.xlane.xlu0 %2730  ;;  %v2733_v34 = vpop.xlane.xlu1 %2732 }
 0x4af   : > { %v4404_v35 = vpop.eup %4403  ;;  %4413 = vpow2.f32 %v2822_v32  ;;  %v5465_v46 = vsub.f32 %v5311_v16, %v2731_v33  ;;  %v5468_v61 = vsub.f32 %v5316_v18, %v2733_v34 }
 0x4b0   : > { %4415 = vpow2.f32 %v2824_v10 }
 0x4b1   : > { %v4406_v63 = vpop.eup %4405  ;;  %v2826_v47 = vmul.f32 1.442695, %v5465_v46  ;;  %v2828_v7 = vmul.f32 1.442695, %v5468_v61 }
 0x4b2   : > { %2876 = vadd.xlane.f32.xlu1 %v4404_v35  ;;  %2878 = vadd.xlane.f32.xlu0 %v4406_v63  ;;  %v2735_v48 = vpop.xlane.xlu0 %2734  ;;  %v2737_v49 = vpop.xlane.xlu1 %2736 }
 0x4b3   : > { %v4408_v50 = vpop.eup %4407  ;;  %4417 = vpow2.f32 %v2826_v47  ;;  %v5473_v24 = vsub.f32 %v5323_v36, %v2735_v48  ;;  %v5476_v16 = vsub.f32 %v5328_v39, %v2737_v49 }
 0x4b4   : > { %4419 = vpow2.f32 %v2828_v7 }
 0x4b5   : > { %v4410_v18 = vpop.eup %4409  ;;  %v2830_v40 = vmul.f32 1.442695, %v5473_v24  ;;  %v2832_v54 = vmul.f32 1.442695, %v5476_v16 }
 0x4b6   : > { %2880 = vadd.xlane.f32.xlu1 %v4408_v50  ;;  %2882 = vadd.xlane.f32.xlu0 %v4410_v18  ;;  %v2739_v56 = vpop.xlane.xlu0 %2738  ;;  %v2741_v52 = vpop.xlane.xlu1 %2740 }
 0x4b7   : > { %v4412_v55 = vpop.eup %4411  ;;  %4421 = vpow2.f32 %v2830_v40  ;;  %v5481_v8 = vsub.f32 %v5335_v58, %v2739_v56  ;;  %v5484_v36 = vsub.f32 %v5340_v60, %v2741_v52 }
 0x4b8   : > { %4423 = vpow2.f32 %v2832_v54 }
 0x4b9   : > { %v4414_v39 = vpop.eup %4413  ;;  %v2834_v57 = vmul.f32 1.442695, %v5481_v8  ;;  %v2836_v59 = vmul.f32 1.442695, %v5484_v36 }
 0x4ba   : > { %2884 = vadd.xlane.f32.xlu1 %v4412_v55  ;;  %2886 = vadd.xlane.f32.xlu0 %v4414_v39  ;;  %v2743_v62 = vpop.xlane.xlu0 %2742  ;;  %v2745_v2 = vpop.xlane.xlu1 %2744 }
 0x4bb   : > { %v4416_v4 = vpop.eup %4415  ;;  %4425 = vpow2.f32 %v2834_v57  ;;  %v5489_v27 = vsub.f32 %v5347_v15, %v2743_v62  ;;  %v5492_v58 = vsub.f32 %v5352_v19, %v2745_v2 }
 0x4bc   : > { %4427 = vpow2.f32 %v2836_v59 }
 0x4bd   : > { %v4418_v60 = vpop.eup %4417  ;;  %v2838_v9 = vmul.f32 1.442695, %v5489_v27  ;;  %v2840_v13 = vmul.f32 1.442695, %v5492_v58 }
 0x4be   : > { %2888 = vadd.xlane.f32.xlu1 %v4416_v4  ;;  %2890 = vadd.xlane.f32.xlu0 %v4418_v60  ;;  %v2747_v14 = vpop.xlane.xlu0 %2746  ;;  %v2749_v20 = vpop.xlane.xlu1 %2748 }
 0x4bf   : > { %v4420_v23 = vpop.eup %4419  ;;  %4429 = vpow2.f32 %v2838_v9  ;;  %v5497_v45 = vsub.f32 %v5359_v41, %v2747_v14  ;;  %v5500_v15 = vsub.f32 %v5364_v44, %v2749_v20 }
 0x4c0   : > { %4431 = vpow2.f32 %v2840_v13 }
 0x4c1   : > { %v4422_v19 = vpop.eup %4421  ;;  %v2842_v32 = vmul.f32 1.442695, %v5497_v45  ;;  %v2844_v10 = vmul.f32 1.442695, %v5500_v15 }
 0x4c2   : > { %2892 = vadd.xlane.f32.xlu1 %v4420_v23  ;;  %2894 = vadd.xlane.f32.xlu0 %v4422_v19  ;;  %v2751_v33 = vpop.xlane.xlu0 %2750  ;;  %v2753_v34 = vpop.xlane.xlu1 %2752 }
 0x4c3   : > { %v4424_v35 = vpop.eup %4423  ;;  %4433 = vpow2.f32 %v2842_v32  ;;  %v5505_v63 = vsub.f32 %v5371_v1, %v2751_v33  ;;  %v5508_v41 = vsub.f32 %v5376_v3, %v2753_v34 }
 0x4c4   : > { %4435 = vpow2.f32 %v2844_v10 }
 0x4c5   : > { %v4426_v44 = vpop.eup %4425  ;;  %v2846_v47 = vmul.f32 1.442695, %v5505_v63  ;;  %v2848_v7 = vmul.f32 1.442695, %v5508_v41 }
 0x4c6   : > { %2896 = vadd.xlane.f32.xlu1 %v4424_v35  ;;  %2898 = vadd.xlane.f32.xlu0 %v4426_v44  ;;  %v2755_v48 = vpop.xlane.xlu0 %2754  ;;  %v2757_v49 = vpop.xlane.xlu1 %2756 }
 0x4c7   : > { %v4428_v50 = vpop.eup %4427  ;;  %4437 = vpow2.f32 %v2846_v47  ;;  %v5513_v18 = vsub.f32 %v5383_v28, %v2755_v48  ;;  %v5516_v1 = vsub.f32 %v5388_v30, %v2757_v49 }
 0x4c8   : > { %4439 = vpow2.f32 %v2848_v7 }
 0x4c9   : > { %v4430_v3 = vpop.eup %4429  ;;  %v2850_v40 = vmul.f32 1.442695, %v5513_v18  ;;  %v2852_v54 = vmul.f32 1.442695, %v5516_v1 }
 0x4ca   : > { %2900 = vadd.xlane.f32.xlu1 %v4428_v50  ;;  %2902 = vadd.xlane.f32.xlu0 %v4430_v3  ;;  %v4432_v56 = vpop.eup %4431 }
 0x4cb   : > { %4441 = vpow2.f32 %v2850_v40 }
 0x4cc   : > { %4443 = vpow2.f32 %v2852_v54 }
 0x4cd   : > { %v4434_v52 = vpop.eup %4433 }
 0x4ce   : > { %2904 = vadd.xlane.f32.xlu1 %v4432_v56  ;;  %2906 = vadd.xlane.f32.xlu0 %v4434_v52  ;;  %v4436_v55 = vpop.eup %4435 }
 0x4d1   : > { %v4438_v28 = vpop.eup %4437 }
 0x4d2   : > { %2908 = vadd.xlane.f32.xlu1 %v4436_v55  ;;  %2910 = vadd.xlane.f32.xlu0 %v4438_v28  ;;  %v4440_v30 = vpop.eup %4439 }
 0x4d5   : > { %v4442_v39 = vpop.eup %4441 }
 0x4d6   : > { %2912 = vadd.xlane.f32.xlu1 %v4440_v30  ;;  %2914 = vadd.xlane.f32.xlu0 %v4442_v39  ;;  %v4444_v57 = vpop.eup %4443 }
 0x4da   : > { %2916 = vadd.xlane.f32.xlu1 %v4444_v57 }
 0x527   : > { %v2855_v59 = vpop.xlane.xlu0 %2854 }
 0x528   : > { %4445 = vlog2.f32 %v2855_v59 }
 0x52b   : > { %v2857_v62 = vpop.xlane.xlu1 %2856  ;;  %v2859_v2 = vpop.xlane.xlu0 %2858 }
 0x52c   : > { %4447 = vlog2.f32 %v2857_v62 }
 0x52d   : > { %4449 = vlog2.f32 %v2859_v2 }
 0x52f   : > { %v2861_v4 = vpop.xlane.xlu1 %2860  ;;  %v2863_v60 = vpop.xlane.xlu0 %2862 }
 0x530   : > { %4451 = vlog2.f32 %v2861_v4 }
 0x531   : > { %4453 = vlog2.f32 %v2863_v60 }
 0x532   : > { %v4446_v9 = vpop.eup %4445 }
 0x533   : > { %v2919_v13 = vmul.f32 0.6931472, %v4446_v9  ;;  %v2865_v14 = vpop.xlane.xlu1 %2864  ;;  %v2867_v20 = vpop.xlane.xlu0 %2866 }
 0x534   : > { %4455 = vlog2.f32 %v2865_v14 }
 0x535   : > { %v2982_v23 = vsub.f32 %v5393_v51, %v2919_v13  ;;  %4457 = vlog2.f32 %v2867_v20 }
 0x536   : > { %v4448_v19 = vpop.eup %4447 }
 0x537   : > { %v4450_v32 = vpop.eup %4449  ;;  %3015 = vst [vmem:[%s5524_s27] sm:$0xff] %v2982_v23  ;;  %v2921_v10 = vmul.f32 0.6931472, %v4448_v19  ;;  %v2869_v33 = vpop.xlane.xlu1 %2868 }
 0x538   : > { %v2871_v34 = vpop.xlane.xlu0 %2870  ;;  %v2923_v35 = vmul.f32 0.6931472, %v4450_v32  ;;  %4459 = vlog2.f32 %v2869_v33 }
 0x539   : > { %v2983_v44 = vsub.f32 %v5401_v21, %v2921_v10  ;;  %4461 = vlog2.f32 %v2871_v34 }
 0x53a   : > { %v4452_v47 = vpop.eup %4451  ;;  %v2984_v7 = vsub.f32 %v5396_v53, %v2923_v35 }
 0x53b   : > { %v4454_v48 = vpop.eup %4453  ;;  %3016 = vst [vmem:[%s5524_s27 + $0x8] sm:$0xff] %v2983_v44  ;;  %v2925_v51 = vmul.f32 0.6931472, %v4452_v47  ;;  %v2873_v49 = vpop.xlane.xlu1 %2872 }
 0x53c   : > { %v2875_v50 = vpop.xlane.xlu0 %2874  ;;  %3017 = vst [vmem:[%s5524_s27 + $0x10] sm:$0xff] %v2984_v7  ;;  %v2927_v3 = vmul.f32 0.6931472, %v4454_v48  ;;  %4463 = vlog2.f32 %v2873_v49 }
 0x53d   : > { %v2985_v40 = vsub.f32 %v5404_v0, %v2925_v51  ;;  %4465 = vlog2.f32 %v2875_v50 }
 0x53e   : > { %v4456_v54 = vpop.eup %4455  ;;  %v2986_v21 = vsub.f32 %v5409_v11, %v2927_v3 }
 0x53f   : > { %v4458_v56 = vpop.eup %4457  ;;  %3018 = vst [vmem:[%s5524_s27 + $0x18] sm:$0xff] %v2985_v40  ;;  %v2929_v53 = vmul.f32 0.6931472, %v4456_v54  ;;  %v2877_v52 = vpop.xlane.xlu1 %2876 }
 0x540   : > { %v2879_v55 = vpop.xlane.xlu0 %2878  ;;  %3019 = vst [vmem:[%s5524_s27 + $0x20] sm:$0xff] %v2986_v21  ;;  %v2931_v28 = vmul.f32 0.6931472, %v4458_v56  ;;  %4467 = vlog2.f32 %v2877_v52 }
 0x541   : > { %v2987_v30 = vsub.f32 %v5412_v12, %v2929_v53  ;;  %4469 = vlog2.f32 %v2879_v55 }
 0x542   : > { %v4460_v39 = vpop.eup %4459  ;;  %v2988_v0 = vsub.f32 %v5417_v26, %v2931_v28 }
 0x543   : > { %v4462_v57 = vpop.eup %4461  ;;  %3020 = vst [vmem:[%s5524_s27 + $0x28] sm:$0xff] %v2987_v30  ;;  %v2933_v11 = vmul.f32 0.6931472, %v4460_v39  ;;  %v2881_v59 = vpop.xlane.xlu1 %2880 }
 0x544   : > { %v2883_v62 = vpop.xlane.xlu0 %2882  ;;  %3021 = vst [vmem:[%s5524_s27 + $0x30] sm:$0xff] %v2988_v0  ;;  %v2935_v2 = vmul.f32 0.6931472, %v4462_v57  ;;  %4471 = vlog2.f32 %v2881_v59 }
 0x545   : > { %v2989_v4 = vsub.f32 %v5420_v29, %v2933_v11  ;;  %4473 = vlog2.f32 %v2883_v62 }
 0x546   : > { %v4464_v60 = vpop.eup %4463  ;;  %v2990_v12 = vsub.f32 %v5425_v37, %v2935_v2 }
 0x547   : > { %v4466_v9 = vpop.eup %4465  ;;  %3022 = vst [vmem:[%s5524_s27 + $0x38] sm:$0xff] %v2989_v4  ;;  %v2937_v26 = vmul.f32 0.6931472, %v4464_v60  ;;  %v2885_v13 = vpop.xlane.xlu1 %2884 }
 0x548   : > { %v2887_v14 = vpop.xlane.xlu0 %2886  ;;  %3023 = vst [vmem:[%s5524_s27 + $0x40] sm:$0xff] %v2990_v12  ;;  %v2939_v20 = vmul.f32 0.6931472, %v4466_v9  ;;  %4475 = vlog2.f32 %v2885_v13 }
 0x549   : > { %v2991_v23 = vsub.f32 %v5428_v42, %v2937_v26  ;;  %4477 = vlog2.f32 %v2887_v14 }
 0x54a   : > { %v4468_v19 = vpop.eup %4467  ;;  %v2992_v29 = vsub.f32 %v5433_v22, %v2939_v20 }
 0x54b   : > { %v4470_v32 = vpop.eup %4469  ;;  %3024 = vst [vmem:[%s5524_s27 + $0x48] sm:$0xff] %v2991_v23  ;;  %v2941_v37 = vmul.f32 0.6931472, %v4468_v19  ;;  %v2889_v10 = vpop.xlane.xlu1 %2888 }
 0x54c   : > { %v2891_v33 = vpop.xlane.xlu0 %2890  ;;  %3025 = vst [vmem:[%s5524_s27 + $0x50] sm:$0xff] %v2992_v29  ;;  %v2943_v34 = vmul.f32 0.6931472, %v4470_v32  ;;  %4479 = vlog2.f32 %v2889_v10 }
 0x54d   : > { %v2993_v35 = vsub.f32 %v5436_v38, %v2941_v37  ;;  %4481 = vlog2.f32 %v2891_v33 }
 0x54e   : > { %v4472_v44 = vpop.eup %4471  ;;  %v2994_v42 = vsub.f32 %v5441_v17, %v2943_v34 }
 0x54f   : > { %v4474_v47 = vpop.eup %4473  ;;  %3026 = vst [vmem:[%s5524_s27 + $0x58] sm:$0xff] %v2993_v35  ;;  %v2945_v22 = vmul.f32 0.6931472, %v4472_v44  ;;  %v2893_v7 = vpop.xlane.xlu1 %2892 }
 0x550   : > { %v2895_v48 = vpop.xlane.xlu0 %2894  ;;  %3027 = vst [vmem:[%s5524_s27 + $0x60] sm:$0xff] %v2994_v42  ;;  %v2947_v51 = vmul.f32 0.6931472, %v4474_v47  ;;  %4483 = vlog2.f32 %v2893_v7 }
 0x551   : > { %v2995_v49 = vsub.f32 %v5444_v6, %v2945_v22  ;;  %4485 = vlog2.f32 %v2895_v48 }
 0x552   : > { %v4476_v50 = vpop.eup %4475  ;;  %v2996_v38 = vsub.f32 %v5449_v5, %v2947_v51 }
 0x553   : > { %v4478_v3 = vpop.eup %4477  ;;  %3028 = vst [vmem:[%s5524_s27 + $0x68] sm:$0xff] %v2995_v49  ;;  %v2949_v17 = vmul.f32 0.6931472, %v4476_v50  ;;  %v2897_v40 = vpop.xlane.xlu1 %2896 }
 0x554   : > { %v2899_v54 = vpop.xlane.xlu0 %2898  ;;  %3029 = vst [vmem:[%s5524_s27 + $0x70] sm:$0xff] %v2996_v38  ;;  %v2951_v21 = vmul.f32 0.6931472, %v4478_v3  ;;  %4487 = vlog2.f32 %v2897_v40 }
 0x555   : > { %v2997_v56 = vsub.f32 %v5452_v25, %v2949_v17  ;;  %4489 = vlog2.f32 %v2899_v54 }
 0x556   : > { %v4480_v53 = vpop.eup %4479  ;;  %v2998_v6 = vsub.f32 %v5457_v31, %v2951_v21 }
 0x557   : > { %v4482_v52 = vpop.eup %4481  ;;  %3030 = vst [vmem:[%s5524_s27 + $0x78] sm:$0xff] %v2997_v56  ;;  %v2953_v5 = vmul.f32 0.6931472, %v4480_v53  ;;  %v2901_v55 = vpop.xlane.xlu1 %2900 }
 0x558   : > { %v2903_v28 = vpop.xlane.xlu0 %2902  ;;  %3031 = vst [vmem:[%s5524_s27 + $0x80] sm:$0xff] %v2998_v6  ;;  %v2955_v30 = vmul.f32 0.6931472, %v4482_v52  ;;  %4491 = vlog2.f32 %v2901_v55 }
 0x559   : > { %v2999_v39 = vsub.f32 %v5460_v43, %v2953_v5  ;;  %4493 = vlog2.f32 %v2903_v28 }
 0x55a   : > { %v4484_v0 = vpop.eup %4483  ;;  %v3000_v25 = vsub.f32 %v5465_v46, %v2955_v30 }
 0x55b   : > { %v4486_v57 = vpop.eup %4485  ;;  %3032 = vst [vmem:[%s5524_s27 + $0x88] sm:$0xff] %v2999_v39  ;;  %v2957_v31 = vmul.f32 0.6931472, %v4484_v0  ;;  %v2905_v11 = vpop.xlane.xlu1 %2904 }
 0x55c   : > { %v2907_v59 = vpop.xlane.xlu0 %2906  ;;  %3033 = vst [vmem:[%s5524_s27 + $0x90] sm:$0xff] %v3000_v25  ;;  %v2959_v62 = vmul.f32 0.6931472, %v4486_v57  ;;  %4495 = vlog2.f32 %v2905_v11 }
 0x55d   : > { %v3001_v2 = vsub.f32 %v5468_v61, %v2957_v31  ;;  %4497 = vlog2.f32 %v2907_v59 }
 0x55e   : > { %v4488_v4 = vpop.eup %4487  ;;  %v3002_v43 = vsub.f32 %v5473_v24, %v2959_v62 }
 0x55f   : > { %v4490_v60 = vpop.eup %4489  ;;  %3034 = vst [vmem:[%s5524_s27 + $0x98] sm:$0xff] %v3001_v2  ;;  %v2961_v46 = vmul.f32 0.6931472, %v4488_v4  ;;  %v2909_v12 = vpop.xlane.xlu1 %2908 }
 0x560   : > { %v2911_v9 = vpop.xlane.xlu0 %2910  ;;  %3035 = vst [vmem:[%s5524_s27 + $0xa0] sm:$0xff] %v3002_v43  ;;  %v2963_v26 = vmul.f32 0.6931472, %v4490_v60  ;;  %4499 = vlog2.f32 %v2909_v12 }
 0x561   : > { %v3003_v13 = vsub.f32 %v5476_v16, %v2961_v46  ;;  %4501 = vlog2.f32 %v2911_v9 }
 0x562   : > { %v4492_v14 = vpop.eup %4491  ;;  %v3004_v61 = vsub.f32 %v5481_v8, %v2963_v26 }
 0x563   : > { %v4494_v20 = vpop.eup %4493  ;;  %3036 = vst [vmem:[%s5524_s27 + $0xa8] sm:$0xff] %v3003_v13  ;;  %v2965_v24 = vmul.f32 0.6931472, %v4492_v14  ;;  %v2913_v23 = vpop.xlane.xlu1 %2912 }
 0x564   : > { %v2915_v19 = vpop.xlane.xlu0 %2914  ;;  %3037 = vst [vmem:[%s5524_s27 + $0xb0] sm:$0xff] %v3004_v61  ;;  %v2967_v29 = vmul.f32 0.6931472, %v4494_v20  ;;  %4503 = vlog2.f32 %v2913_v23 }
 0x565   : > { %v3005_v32 = vsub.f32 %v5484_v36, %v2965_v24  ;;  %4505 = vlog2.f32 %v2915_v19 }
 0x566   : > { %v4496_v16 = vpop.eup %4495  ;;  %v3006_v37 = vsub.f32 %v5489_v27, %v2967_v29 }
 0x567   : > { %v4498_v10 = vpop.eup %4497  ;;  %3038 = vst [vmem:[%s5524_s27 + $0xb8] sm:$0xff] %v3005_v32  ;;  %v2969_v8 = vmul.f32 0.6931472, %v4496_v16  ;;  %v2917_v33 = vpop.xlane.xlu1 %2916 }
 0x568   : > { %3039 = vst [vmem:[%s5524_s27 + $0xc0] sm:$0xff] %v3006_v37  ;;  %v2971_v34 = vmul.f32 0.6931472, %v4498_v10  ;;  %4507 = vlog2.f32 %v2917_v33 }
 0x569   : > { %v3007_v35 = vsub.f32 %v5492_v58, %v2969_v8 }
 0x56a   : > { %v4500_v44 = vpop.eup %4499  ;;  %v3008_v42 = vsub.f32 %v5497_v45, %v2971_v34 }
 0x56b   : > { %v4502_v36 = vpop.eup %4501  ;;  %3040 = vst [vmem:[%s5524_s27 + $0xc8] sm:$0xff] %v3007_v35  ;;  %v2973_v47 = vmul.f32 0.6931472, %v4500_v44 }
 0x56c   : > { %3041 = vst [vmem:[%s5524_s27 + $0xd0] sm:$0xff] %v3008_v42  ;;  %v2975_v27 = vmul.f32 0.6931472, %v4502_v36 }
 0x56d   : > { %v3009_v22 = vsub.f32 %v5500_v15, %v2973_v47 }
 0x56e   : > { %v4504_v7 = vpop.eup %4503  ;;  %v3010_v48 = vsub.f32 %v5505_v63, %v2975_v27 }
 0x56f   : > { %v4506_v51 = vpop.eup %4505  ;;  %3042 = vst [vmem:[%s5524_s27 + $0xd8] sm:$0xff] %v3009_v22  ;;  %v2977_v49 = vmul.f32 0.6931472, %v4504_v7 }
 0x570   : > { %3043 = vst [vmem:[%s5524_s27 + $0xe0] sm:$0xff] %v3010_v48  ;;  %v2979_v58 = vmul.f32 0.6931472, %v4506_v51 }
 0x571   : > { %v3011_v45 = vsub.f32 %v5508_v41, %v2977_v49 }
 0x572   : > { %v4508_v50 = vpop.eup %4507  ;;  %v3012_v38 = vsub.f32 %v5513_v18, %v2979_v58 }
 0x573   : > { %3044 = vst [vmem:[%s5524_s27 + $0xe8] sm:$0xff] %v3011_v45  ;;  %v2981_v3 = vmul.f32 0.6931472, %v4508_v50 }
 0x574   : > { %3045 = vst [vmem:[%s5524_s27 + $0xf0] sm:$0xff] %v3012_v38 }
 0x575   : > { %v3013_v17 = vsub.f32 %v5516_v1, %v2981_v3 }
 0x577   : > { %3046 = vst [vmem:[%s5524_s27 + $0xf8] sm:$0xff] %v3013_v17 }
 0x578 PF: > { %s20_s13 = sadd.s32 1, %s4547_s13   ;;  %s5617_s17 = sld [smem:[#allocation4_spill]] }
 0x579   : > { %p17_p1 = scmp.ge.s32.totalorder %s20_s13, 8   ;;  %s5618_s14 = sld [smem:[#allocation5_spill]] }
 0x57a   : > { %s5619_s30 = smov %s4539_s11  ;;  %s5620_s10 = smov %s4543_s12 }
 0x57b   :  { %19 = sbr.rel (!%p17_p1) target bundleno = 3 (0x3), region = 129 }
 0x57e   : > { %s5621_s11 = smov %s5617_s17 }
 0x57f   : > { %s5622_s12 = smov %s5618_s14 }

</bundles_post_ra>
